<compile_context>
chip_gen: v6e
topology: v6e:2x2x1
jax: 0.10.0
libtpu: 0.0.40
codegen_flags: <defaults>
</compile_context>

<pallas_src>
import functools

import jax
import jax.numpy as jnp
from jax.experimental import pallas as pl
from jax.experimental.pallas import tpu as pltpu


# ------------------------------------------------------------------ helpers

def _layernorm_f32(x, g, b, eps=1e-5):
    mean = jnp.mean(x, axis=-1, keepdims=True)
    var = jnp.mean((x - mean) ** 2, axis=-1, keepdims=True)
    return (x - mean) * jax.lax.rsqrt(var + eps) * g + b


def _erf_poly(x):
    # Abramowitz & Stegun 7.1.26 (max abs err ~1.5e-7): exact-GELU parity
    # using only exp/abs/where/mul/add (no reliance on an erf lowering).
    a1, a2, a3, a4, a5 = (0.254829592, -0.284496736, 1.421413741,
                          -1.453152027, 1.061405429)
    p = 0.3275911
    ax = jnp.abs(x)
    t = 1.0 / (1.0 + p * ax)
    poly = t * (a1 + t * (a2 + t * (a3 + t * (a4 + t * a5))))
    y = 1.0 - poly * jnp.exp(-ax * ax)
    return jnp.where(x < 0.0, -y, y)


def _gelu_exact(x):
    return 0.5 * x * (1.0 + _erf_poly(x * 0.7071067811865476))


def _tile(total, target, quantum):
    """Largest multiple-of-`quantum` divisor of `total` that is <= target.
    Falls back to the full extent (valid: block dim == full array dim); note
    the fallback can produce a large block for awkward sizes."""
    if total <= target or total % quantum != 0:
        return total
    t = (target // quantum) * quantum
    while t >= quantum:
        if total % t == 0:
            return t
        t -= quantum
    return total


def _vmem_limit(est_bytes, lo_mib=32, hi_mib=56):
    # Cap at 56 MiB so the scoped request stays under v7x's 64 MiB physical
    # VMEM; v5e/v6e (128 MiB) accommodate it easily.
    return int(min(hi_mib * 2**20, max(lo_mib * 2**20, 2 * est_bytes)))


# ------------------------------------------------------------------ kernels

def _attn_kernel(q_ref, kv_ref, g1_ref, b1_ref, qwh_ref, kwh_ref, vwh_ref,
                 pw_ref, pb_ref, o_ref, qp_sc, m_sc, l_sc, acc_sc, o_sc, *,
                 num_heads):
    """Flash-style encoder-decoder attention, one (batch, q-tile) per scratch
    lifetime, online softmax over kv tiles along the last ('arbitrary') axis."""
    ki = pl.program_id(2)
    H = num_heads
    _, tq, C = q_ref.shape
    D = C // H

    @pl.when(ki == 0)
    def _():
        # LN1 fused as prologue; qk-scale already folded into q weights.
        x = q_ref[0].astype(jnp.float32)                            # (tq, C)
        xn = _layernorm_f32(x, g1_ref[...].astype(jnp.float32),
                            b1_ref[...].astype(jnp.float32)).astype(jnp.bfloat16)
        for h in range(H):                      # static unroll, per-head weights
            qp_sc[h] = jnp.dot(xn, qwh_ref[h],
                               preferred_element_type=jnp.float32
                               ).astype(jnp.bfloat16)               # (tq, D)
        m_sc[...] = jnp.full(m_sc.shape, -jnp.inf, jnp.float32)
        l_sc[...] = jnp.zeros(l_sc.shape, jnp.float32)
        acc_sc[...] = jnp.zeros(acc_sc.shape, jnp.float32)

    kv_t = kv_ref[0].astype(jnp.bfloat16)                           # (tk, Ckv)
    for h in range(H):
        # Per-head kv projection (pre-split weights -> no lane slicing of k/v).
        k_h = jnp.dot(kv_t, kwh_ref[h],
                      preferred_element_type=jnp.float32).astype(jnp.bfloat16)
        v_h = jnp.dot(kv_t, vwh_ref[h],
                      preferred_element_type=jnp.float32).astype(jnp.bfloat16)
        # scores (tq, tk) in f32; q already scaled via the weight.
        s = jax.lax.dot_general(qp_sc[h], k_h, (((1,), (1,)), ((), ())),
                                preferred_element_type=jnp.float32)
        m_prev = m_sc[h]                                            # (tq, 1)
        m_new = jnp.maximum(m_prev, jnp.max(s, axis=-1, keepdims=True))
        alpha = jnp.exp(m_prev - m_new)
        p = jnp.exp(s - m_new)
        l_sc[h] = alpha * l_sc[h] + jnp.sum(p, axis=-1, keepdims=True)
        acc_sc[h] = alpha * acc_sc[h] + jnp.dot(
            p.astype(jnp.bfloat16), v_h, preferred_element_type=jnp.float32)
        m_sc[h] = m_new

    @pl.when(ki == pl.num_programs(2) - 1)
    def _():
        # Merge heads into one (tq, C) buffer, then a single full-C projection
        # (no per-head K=D projection matmuls / repeated (tq, C) adds).
        for h in range(H):
            o_sc[:, h * D:(h + 1) * D] = acc_sc[h] / l_sc[h]        # exact divide
        proj = jnp.dot(o_sc[...].astype(jnp.bfloat16), pw_ref[...],
                       preferred_element_type=jnp.float32)
        # Residual re-read here (same resident block) instead of a live range.
        o_ref[0] = (q_ref[0].astype(jnp.float32) + proj
                    + pb_ref[...].astype(jnp.float32)).astype(o_ref.dtype)


def _mlp_kernel(x_ref, g2_ref, b2_ref, w1_ref, fb1_ref, w2_ref, fb2_ref,
                o_ref, yn_sc, acc_sc):
    """Row-tiled LN2 -> fc1 + exact GELU -> fc2, hidden dim tiled and
    accumulated in VMEM scratch.  fc2_w/fc2_b carry the module's `x2 + x2`
    doubling (folded at param-prep)."""
    hi = pl.program_id(1)

    @pl.when(hi == 0)
    def _():
        x = x_ref[...].astype(jnp.float32)                          # (tr, C)
        yn = _layernorm_f32(x, g2_ref[...].astype(jnp.float32),
                            b2_ref[...].astype(jnp.float32))
        yn_sc[...] = yn.astype(jnp.bfloat16)
        acc_sc[...] = jnp.zeros(acc_sc.shape, jnp.float32)

    h = jnp.dot(yn_sc[...], w1_ref[...], preferred_element_type=jnp.float32)
    h = _gelu_exact(h + fb1_ref[...].astype(jnp.float32))
    acc_sc[...] += jnp.dot(h.astype(jnp.bfloat16), w2_ref[...],
                           preferred_element_type=jnp.float32)

    @pl.when(hi == pl.num_programs(1) - 1)
    def _():
        o_ref[...] = (acc_sc[...] + fb2_ref[...].astype(jnp.float32)
                      ).astype(o_ref.dtype)


# ----------------------------------------------------------------- wrappers

def fused_attn_block(q, kv, kp, num_heads, *, tq_target=256, tk_target=512):
    B, N, C = q.shape
    _, M, Ckv = kv.shape
    H = num_heads
    D = C // H
    tq = _tile(N, tq_target, 8)     # query-row tile (review: 128-256 on v7x)
    tk = _tile(M, tk_target, 8)     # kv tile for the flash loop

    est = (2 * 4 * (2 * tq * C + tk * Ckv)                 # pipelined q/out/kv blocks
           + 2 * 2 * (2 * C * C + 2 * Ckv * C + 2 * C)     # resident bf16 weights
           + 2 * H * tq * D + 4 * H * tq * (D + 2)         # qp/m/l/acc scratch
           + 4 * tq * C                                    # head-merge scratch
           + 4 * (3 * tq * tk + 2 * tk * D))               # per-step workspace

    kern = functools.partial(_attn_kernel, num_heads=H)
    return pl.pallas_call(
        kern,
        out_shape=jax.ShapeDtypeStruct((B, N, C), q.dtype),
        grid=(B, N // tq, M // tk),
        in_specs=[
            pl.BlockSpec((1, tq, C), lambda b, qi, ki: (b, qi, 0)),    # q
            pl.BlockSpec((1, tk, Ckv), lambda b, qi, ki: (b, ki, 0)),  # kv tile
            pl.BlockSpec((1, C), lambda b, qi, ki: (0, 0)),            # ln1 gamma
            pl.BlockSpec((1, C), lambda b, qi, ki: (0, 0)),            # ln1 beta
            pl.BlockSpec((H, C, D), lambda b, qi, ki: (0, 0, 0)),      # q_w*scale (per head, bf16)
            pl.BlockSpec((H, Ckv, D), lambda b, qi, ki: (0, 0, 0)),    # kv_w K half (per head)
            pl.BlockSpec((H, Ckv, D), lambda b, qi, ki: (0, 0, 0)),    # kv_w V half (per head)
            pl.BlockSpec((C, C), lambda b, qi, ki: (0, 0)),            # proj_w (full-C)
            pl.BlockSpec((1, C), lambda b, qi, ki: (0, 0)),            # proj_b
        ],
        out_specs=pl.BlockSpec((1, tq, C), lambda b, qi, ki: (b, qi, 0)),
        scratch_shapes=[
            pltpu.VMEM((H, tq, D), jnp.bfloat16),   # normed+scaled q heads
            pltpu.VMEM((H, tq, 1), jnp.float32),    # running max
            pltpu.VMEM((H, tq, 1), jnp.float32),    # running denom
            pltpu.VMEM((H, tq, D), jnp.float32),    # running numerator
            pltpu.VMEM((tq, C), jnp.float32),       # merged heads (epilogue)
        ],
        compiler_params=pltpu.CompilerParams(
            dimension_semantics=("parallel", "parallel", "arbitrary"),
            vmem_limit_bytes=_vmem_limit(est)),
    )(q, kv, kp["ln1_g"], kp["ln1_b"], kp["q_w_h"], kp["kv_w_k_h"],
      kp["kv_w_v_h"], kp["proj_w"], kp["proj_b"])


def fused_mlp_block(x, kp, *, tr_target=256, th_target=512):
    # v5e/v6e (128 MiB VMEM) can sweep tr_target toward 512; keep ~256 for v7x.
    R, C = x.shape
    Hd = kp["fc1_w"].shape[1]
    tr = _tile(R, tr_target, 8)
    th = _tile(Hd, th_target, 128)

    est = (2 * 4 * (2 * tr * C)                      # pipelined x / out blocks
           + 2 * 2 * (C * th + th * C + th + C)      # bf16 fc weight tiles + biases
           + 2 * tr * C + 4 * tr * C                 # yn / acc scratch
           + 2 * 4 * tr * th)                        # hidden activations

    return pl.pallas_call(
        _mlp_kernel,
        out_shape=jax.ShapeDtypeStruct((R, C), x.dtype),
        grid=(R // tr, Hd // th),
        in_specs=[
            pl.BlockSpec((tr, C), lambda i, hi: (i, 0)),      # x1 row tile
            pl.BlockSpec((1, C), lambda i, hi: (0, 0)),       # ln2 gamma
            pl.BlockSpec((1, C), lambda i, hi: (0, 0)),       # ln2 beta
            pl.BlockSpec((C, th), lambda i, hi: (0, hi)),     # fc1_w column tile
            pl.BlockSpec((1, th), lambda i, hi: (0, hi)),     # fc1_b tile
            pl.BlockSpec((th, C), lambda i, hi: (hi, 0)),     # fc2_w row tile (x2 folded)
            pl.BlockSpec((1, C), lambda i, hi: (0, 0)),       # fc2_b (x2 folded)
        ],
        out_specs=pl.BlockSpec((tr, C), lambda i, hi: (i, 0)),
        scratch_shapes=[pltpu.VMEM((tr, C), jnp.bfloat16),    # LN2(x) row tile
                        pltpu.VMEM((tr, C), jnp.float32)],    # fc2 accumulator
        compiler_params=pltpu.CompilerParams(
            dimension_semantics=("parallel", "arbitrary"),
            vmem_limit_bytes=_vmem_limit(est)),
    )(x, kp["ln2_g"], kp["ln2_b"], kp["fc1_w"], kp["fc1_b"],
      kp["fc2_w"], kp["fc2_b"])


# --------------------------------------------------------------- full block

def enc_dec_block(kp, q, kv, num_heads):
    B, N, C = q.shape
    x1 = fused_attn_block(q, kv, kp, num_heads)        # LN1 + attn + residual
    # TODO(synk): for memory-bound configs, fuse LN2+MLP into the attention
    # epilogue to avoid the x1 round-trip through HBM.
    out = fused_mlp_block(x1.reshape(B * N, C), kp)    # LN2 + MLP (x2 folded)
    return out.reshape(B, N, C)


# --------------------------------------------------------------- param prep

def prep_kernel_params(p, num_heads):
    """bf16 weights, qk-scale folded into q_w, module's final doubling folded
    into fc2, and per-head pre-split q/kv weights (no in-kernel lane slicing)."""
    C = p["q_w"].shape[0]
    Ckv = p["kv_w"].shape[0]
    Hd = p["fc1_w"].shape[1]
    H = num_heads
    D = C // H
    scale = D ** (-0.5)
    bf = jnp.bfloat16
    f32 = jnp.float32

    def per_head(w):                                  # (in, C) -> (H, in, D)
        return jnp.transpose(w.reshape(w.shape[0], H, D), (1, 0, 2)).astype(bf)

    return {
        "ln1_g": p["ln1_g"].reshape(1, C).astype(f32),
        "ln1_b": p["ln1_b"].reshape(1, C).astype(f32),
        "ln2_g": p["ln2_g"].reshape(1, C).astype(f32),
        "ln2_b": p["ln2_b"].reshape(1, C).astype(f32),
        "q_w_h": per_head(p["q_w"] * scale),          # (H, C, D), scale folded
        "kv_w_k_h": per_head(p["kv_w"][:, :C]),       # (H, Ckv, D)
        "kv_w_v_h": per_head(p["kv_w"][:, C:]),       # (H, Ckv, D)
        "proj_w": p["proj_w"].astype(bf),             # (C, C) full-C projection
        "proj_b": p["proj_b"].reshape(1, C).astype(f32),
        "fc1_w": p["fc1_w"].astype(bf),
        "fc1_b": p["fc1_b"].reshape(1, Hd).astype(f32),
        "fc2_w": (2.0 * p["fc2_w"]).astype(bf),       # final x2+x2 folded in
        "fc2_b": (2.0 * p["fc2_b"]).reshape(1, C).astype(f32),
    }


# -------------------------------------------------- pure-JAX reference check

def ref_forward(params, q, kv, num_heads):
    B, N, C = q.shape
    H = num_heads
    D = C // H
    scale = D ** (-0.5)

    def ln(x, g, b):
        m = x.mean(-1, keepdims=True)
        v = ((x - m) ** 2).mean(-1, keepdims=True)
        return (x - m) * jax.lax.rsqrt(v + 1e-5) * g + b

    xn = ln(q, params["ln1_g"], params["ln1_b"])
    qp = xn @ params["q_w"]
    kvp = kv @ params["kv_w"]
    k = kvp[..., :C].reshape(B, -1, H, D).transpose(0, 2, 1, 3)
    v = kvp[..., C:].reshape(B, -1, H, D).transpose(0, 2, 1, 3)
    qh = qp.reshape(B, N, H, D).transpose(0, 2, 1, 3) * scale
    attn = jax.nn.softmax(jnp.einsum("bhnd,bhmd->bhnm", qh, k), axis=-1)
    o = jnp.einsum("bhnm,bhmd->bhnd", attn, v).transpose(0, 2, 1, 3)
    o = o.reshape(B, N, C) @ params["proj_w"] + params["proj_b"]
    x1 = q + o
    y = ln(x1, params["ln2_g"], params["ln2_b"])
    h = jax.nn.gelu(y @ params["fc1_w"] + params["fc1_b"], approximate=False)
    x2 = h @ params["fc2_w"] + params["fc2_b"]
    return x2 + x2


# -------------------------------------------------------------------- main

if __name__ == "__main__":
    B, N, M = 2, 8, 8
    q_dim, kv_dim, num_heads = 32, 16, 4
    mlp_hidden = int(q_dim * 4.0)

    key = jax.random.PRNGKey(0)
    ks = jax.random.split(key, 10)

    def w_init(k, shape):
        return (0.02 * jax.random.normal(k, shape)).astype(jnp.float32)

    params = {
        "ln1_g": jnp.ones((q_dim,), jnp.float32),
        "ln1_b": jnp.zeros((q_dim,), jnp.float32),
        "ln2_g": jnp.ones((q_dim,), jnp.float32),
        "ln2_b": jnp.zeros((q_dim,), jnp.float32),
        # weights stored as (in, out) = PyTorch weight transposed
        "q_w": w_init(ks[0], (q_dim, q_dim)),
        "kv_w": w_init(ks[1], (kv_dim, 2 * q_dim)),
        "proj_w": w_init(ks[2], (q_dim, q_dim)),
        "proj_b": w_init(ks[3], (q_dim,)),
        "fc1_w": w_init(ks[4], (q_dim, mlp_hidden)),
        "fc1_b": w_init(ks[5], (mlp_hidden,)),
        "fc2_w": w_init(ks[6], (mlp_hidden, q_dim)),
        "fc2_b": w_init(ks[7], (q_dim,)),
    }

    q = jax.random.normal(ks[8], (B, N, q_dim), jnp.float32)
    kv = jax.random.normal(ks[9], (B, M, kv_dim), jnp.float32)

    kparams = prep_kernel_params(params, num_heads)
    fwd = jax.jit(functools.partial(enc_dec_block, num_heads=num_heads))
    out = fwd(kparams, q, kv)
    jax.block_until_ready(out)

    assert out.shape == (B, N, q_dim)
    assert bool(jnp.isfinite(out).all())

    # Reference uses full-f32 weights; kernel uses bf16 weights/operands with
    # f32 accumulation, so allow a bf16-sized tolerance.
    ref = ref_forward(params, q, kv, num_heads)
    max_err = float(jnp.max(jnp.abs(out - ref)))
    assert bool(jnp.allclose(out, ref, atol=3e-3, rtol=3e-2)), f"max|err|={max_err}"

    print("KERNEL_OK")
</pallas_src>

<mosaic_0001>
module attributes {stable_mosaic.version = 11 : i64} {
  func.func @_attn_kernel(%arg0: i32, %arg1: i32, %arg2: i32, %arg3: memref<1x8x32xf32, #tpu.memory_space<vmem>>, %arg4: memref<1x8x16xf32, #tpu.memory_space<vmem>>, %arg5: memref<1x32xf32, #tpu.memory_space<vmem>>, %arg6: memref<1x32xf32, #tpu.memory_space<vmem>>, %arg7: memref<4x32x8xbf16, #tpu.memory_space<vmem>>, %arg8: memref<4x16x8xbf16, #tpu.memory_space<vmem>>, %arg9: memref<4x16x8xbf16, #tpu.memory_space<vmem>>, %arg10: memref<32x32xbf16, #tpu.memory_space<vmem>>, %arg11: memref<1x32xf32, #tpu.memory_space<vmem>>, %arg12: memref<1x8x32xf32, #tpu.memory_space<vmem>>, %arg13: memref<4x8x8xbf16, #tpu.memory_space<vmem>>, %arg14: memref<4x8x1xf32, #tpu.memory_space<vmem>>, %arg15: memref<4x8x1xf32, #tpu.memory_space<vmem>>, %arg16: memref<4x8x8xf32, #tpu.memory_space<vmem>>, %arg17: memref<8x32xf32, #tpu.memory_space<vmem>>) attributes {dimension_semantics = [#tpu.dimension_semantics<parallel>, #tpu.dimension_semantics<parallel>, #tpu.dimension_semantics<arbitrary>], iteration_bounds = array<i64: 2, 1, 1>, scalar_prefetch = 0 : i64, scratch_operands = 5 : i64, tpu.core_type = #tpu.core_type<tc>, window_params = [{transform_indices = @transform_0, window_bounds = array<i64: 1, 8, 32>}, {transform_indices = @transform_1, window_bounds = array<i64: 1, 8, 16>}, {pipeline_mode = #tpu.pipeline_mode<synchronous>, transform_indices = @transform_2, window_bounds = array<i64: 1, 32>}, {pipeline_mode = #tpu.pipeline_mode<synchronous>, transform_indices = @transform_3, window_bounds = array<i64: 1, 32>}, {pipeline_mode = #tpu.pipeline_mode<synchronous>, transform_indices = @transform_4, window_bounds = array<i64: 4, 32, 8>}, {pipeline_mode = #tpu.pipeline_mode<synchronous>, transform_indices = @transform_5, window_bounds = array<i64: 4, 16, 8>}, {pipeline_mode = #tpu.pipeline_mode<synchronous>, transform_indices = @transform_6, window_bounds = array<i64: 4, 16, 8>}, {pipeline_mode = #tpu.pipeline_mode<synchronous>, transform_indices = @transform_7, window_bounds = array<i64: 32, 32>}, {pipeline_mode = #tpu.pipeline_mode<synchronous>, transform_indices = @transform_8, window_bounds = array<i64: 1, 32>}, {transform_indices = @transform_9, window_bounds = array<i64: 1, 8, 32>}]} {
    %c0_i32 = arith.constant 0 : i32
    %0 = arith.cmpi eq, %arg2, %c0_i32 : i32
    %1 = arith.extui %0 : i1 to i32
    %c0_i32_0 = arith.constant 0 : i32
    %2 = arith.cmpi ne, %1, %c0_i32_0 : i32
    scf.if %2 {
      %c0_133 = arith.constant 0 : index
      %c0_134 = arith.constant 0 : index
      %c0_135 = arith.constant 0 : index
      %181 = vector.load %arg3[%c0_133, %c0_134, %c0_135] : memref<1x8x32xf32, #tpu.memory_space<vmem>>, vector<1x8x32xf32>
      %182 = vector.shape_cast %181 : vector<1x8x32xf32> to vector<8x32xf32>
      %c0_136 = arith.constant 0 : index
      %c0_137 = arith.constant 0 : index
      %183 = vector.load %arg5[%c0_136, %c0_137] : memref<1x32xf32, #tpu.memory_space<vmem>>, vector<1x32xf32>
      %c0_138 = arith.constant 0 : index
      %c0_139 = arith.constant 0 : index
      %184 = vector.load %arg6[%c0_138, %c0_139] : memref<1x32xf32, #tpu.memory_space<vmem>>, vector<1x32xf32>
      %cst_140 = arith.constant dense<0.000000e+00> : vector<8xf32>
      %185 = vector.multi_reduction <add>, %182, %cst_140 [1] : vector<8x32xf32> to vector<8xf32>
      %186 = vector.shape_cast %185 : vector<8xf32> to vector<8x1xf32>
      %cst_141 = arith.constant 3.200000e+01 : f32
      %187 = vector.broadcast %cst_141 : f32 to vector<8x1xf32>
      %188 = arith.divf %186, %187 : vector<8x1xf32>
      %189 = vector.broadcast %188 : vector<8x1xf32> to vector<8x32xf32>
      %190 = arith.subf %182, %189 : vector<8x32xf32>
      %191 = arith.mulf %190, %190 : vector<8x32xf32>
      %cst_142 = arith.constant dense<0.000000e+00> : vector<8xf32>
      %192 = vector.multi_reduction <add>, %191, %cst_142 [1] : vector<8x32xf32> to vector<8xf32>
      %193 = vector.shape_cast %192 : vector<8xf32> to vector<8x1xf32>
      %cst_143 = arith.constant 3.200000e+01 : f32
      %194 = vector.broadcast %cst_143 : f32 to vector<8x1xf32>
      %195 = arith.divf %193, %194 : vector<8x1xf32>
      %196 = vector.broadcast %188 : vector<8x1xf32> to vector<8x32xf32>
      %197 = arith.subf %182, %196 : vector<8x32xf32>
      %cst_144 = arith.constant 9.99999974E-6 : f32
      %198 = vector.broadcast %cst_144 : f32 to vector<8x1xf32>
      %199 = arith.addf %195, %198 : vector<8x1xf32>
      %200 = math.rsqrt %199 : vector<8x1xf32>
      %201 = vector.broadcast %200 : vector<8x1xf32> to vector<8x32xf32>
      %202 = arith.mulf %197, %201 : vector<8x32xf32>
      %203 = vector.broadcast %183 : vector<1x32xf32> to vector<8x32xf32>
      %204 = arith.mulf %202, %203 : vector<8x32xf32>
      %205 = vector.broadcast %184 : vector<1x32xf32> to vector<8x32xf32>
      %206 = arith.addf %204, %205 : vector<8x32xf32>
      %207 = arith.truncf %206 : vector<8x32xf32> to vector<8x32xbf16>
      %c0_145 = arith.constant 0 : index
      %c0_146 = arith.constant 0 : index
      %c0_147 = arith.constant 0 : index
      %208 = vector.load %arg7[%c0_145, %c0_146, %c0_147] : memref<4x32x8xbf16, #tpu.memory_space<vmem>>, vector<1x32x8xbf16>
      %209 = vector.shape_cast %208 : vector<1x32x8xbf16> to vector<32x8xbf16>
      %cst_148 = arith.constant dense<0.000000e+00> : vector<8x8xf32>
      %210 = tpu.matmul %207, %209, %cst_148 {dimension_numbers = #tpu.dot_dimension_numbers<[1], [0], [0], [1], [0, 0, 1, 1], [], []>} : vector<8x32xbf16>, vector<32x8xbf16>, vector<8x8xf32> -> vector<8x8xf32>
      %211 = arith.truncf %210 : vector<8x8xf32> to vector<8x8xbf16>
      %c0_149 = arith.constant 0 : index
      %c0_150 = arith.constant 0 : index
      %c0_151 = arith.constant 0 : index
      %212 = vector.load %arg13[%c0_149, %c0_150, %c0_151] : memref<4x8x8xbf16, #tpu.memory_space<vmem>>, vector<1x8x8xbf16>
      %213 = vector.shape_cast %212 : vector<1x8x8xbf16> to vector<8x8xbf16>
      %214 = vector.shape_cast %211 : vector<8x8xbf16> to vector<1x8x8xbf16>
      tpu.vector_store %arg13[%c0_149, %c0_150, %c0_151], %214 {strides = array<i32>} : memref<4x8x8xbf16, #tpu.memory_space<vmem>>, vector<1x8x8xbf16>,
      %c1_152 = arith.constant 1 : index
      %c0_153 = arith.constant 0 : index
      %c0_154 = arith.constant 0 : index
      %215 = vector.load %arg7[%c1_152, %c0_153, %c0_154] : memref<4x32x8xbf16, #tpu.memory_space<vmem>>, vector<1x32x8xbf16>
      %216 = vector.shape_cast %215 : vector<1x32x8xbf16> to vector<32x8xbf16>
      %cst_155 = arith.constant dense<0.000000e+00> : vector<8x8xf32>
      %217 = tpu.matmul %207, %216, %cst_155 {dimension_numbers = #tpu.dot_dimension_numbers<[1], [0], [0], [1], [0, 0, 1, 1], [], []>} : vector<8x32xbf16>, vector<32x8xbf16>, vector<8x8xf32> -> vector<8x8xf32>
      %218 = arith.truncf %217 : vector<8x8xf32> to vector<8x8xbf16>
      %c1_156 = arith.constant 1 : index
      %c0_157 = arith.constant 0 : index
      %c0_158 = arith.constant 0 : index
      %219 = vector.load %arg13[%c1_156, %c0_157, %c0_158] : memref<4x8x8xbf16, #tpu.memory_space<vmem>>, vector<1x8x8xbf16>
      %220 = vector.shape_cast %219 : vector<1x8x8xbf16> to vector<8x8xbf16>
      %221 = vector.shape_cast %218 : vector<8x8xbf16> to vector<1x8x8xbf16>
      tpu.vector_store %arg13[%c1_156, %c0_157, %c0_158], %221 {strides = array<i32>} : memref<4x8x8xbf16, #tpu.memory_space<vmem>>, vector<1x8x8xbf16>,
      %c2_159 = arith.constant 2 : index
      %c0_160 = arith.constant 0 : index
      %c0_161 = arith.constant 0 : index
      %222 = vector.load %arg7[%c2_159, %c0_160, %c0_161] : memref<4x32x8xbf16, #tpu.memory_space<vmem>>, vector<1x32x8xbf16>
      %223 = vector.shape_cast %222 : vector<1x32x8xbf16> to vector<32x8xbf16>
      %cst_162 = arith.constant dense<0.000000e+00> : vector<8x8xf32>
      %224 = tpu.matmul %207, %223, %cst_162 {dimension_numbers = #tpu.dot_dimension_numbers<[1], [0], [0], [1], [0, 0, 1, 1], [], []>} : vector<8x32xbf16>, vector<32x8xbf16>, vector<8x8xf32> -> vector<8x8xf32>
      %225 = arith.truncf %224 : vector<8x8xf32> to vector<8x8xbf16>
      %c2_163 = arith.constant 2 : index
      %c0_164 = arith.constant 0 : index
      %c0_165 = arith.constant 0 : index
      %226 = vector.load %arg13[%c2_163, %c0_164, %c0_165] : memref<4x8x8xbf16, #tpu.memory_space<vmem>>, vector<1x8x8xbf16>
      %227 = vector.shape_cast %226 : vector<1x8x8xbf16> to vector<8x8xbf16>
      %228 = vector.shape_cast %225 : vector<8x8xbf16> to vector<1x8x8xbf16>
      tpu.vector_store %arg13[%c2_163, %c0_164, %c0_165], %228 {strides = array<i32>} : memref<4x8x8xbf16, #tpu.memory_space<vmem>>, vector<1x8x8xbf16>,
      %c3_166 = arith.constant 3 : index
      %c0_167 = arith.constant 0 : index
      %c0_168 = arith.constant 0 : index
      %229 = vector.load %arg7[%c3_166, %c0_167, %c0_168] : memref<4x32x8xbf16, #tpu.memory_space<vmem>>, vector<1x32x8xbf16>
      %230 = vector.shape_cast %229 : vector<1x32x8xbf16> to vector<32x8xbf16>
      %cst_169 = arith.constant dense<0.000000e+00> : vector<8x8xf32>
      %231 = tpu.matmul %207, %230, %cst_169 {dimension_numbers = #tpu.dot_dimension_numbers<[1], [0], [0], [1], [0, 0, 1, 1], [], []>} : vector<8x32xbf16>, vector<32x8xbf16>, vector<8x8xf32> -> vector<8x8xf32>
      %232 = arith.truncf %231 : vector<8x8xf32> to vector<8x8xbf16>
      %c3_170 = arith.constant 3 : index
      %c0_171 = arith.constant 0 : index
      %c0_172 = arith.constant 0 : index
      %233 = vector.load %arg13[%c3_170, %c0_171, %c0_172] : memref<4x8x8xbf16, #tpu.memory_space<vmem>>, vector<1x8x8xbf16>
      %234 = vector.shape_cast %233 : vector<1x8x8xbf16> to vector<8x8xbf16>
      %235 = vector.shape_cast %232 : vector<8x8xbf16> to vector<1x8x8xbf16>
      tpu.vector_store %arg13[%c3_170, %c0_171, %c0_172], %235 {strides = array<i32>} : memref<4x8x8xbf16, #tpu.memory_space<vmem>>, vector<1x8x8xbf16>,
      %cst_173 = arith.constant 0xFF800000 : f32
      %236 = vector.broadcast %cst_173 : f32 to vector<4x8x1xf32>
      %c0_174 = arith.constant 0 : index
      %c0_175 = arith.constant 0 : index
      %c0_176 = arith.constant 0 : index
      %237 = vector.load %arg14[%c0_174, %c0_175, %c0_176] : memref<4x8x1xf32, #tpu.memory_space<vmem>>, vector<4x8x1xf32>
      tpu.vector_store %arg14[%c0_174, %c0_175, %c0_176], %236 {strides = array<i32>} : memref<4x8x1xf32, #tpu.memory_space<vmem>>, vector<4x8x1xf32>,
      %cst_177 = arith.constant 0.000000e+00 : f32
      %238 = vector.broadcast %cst_177 : f32 to vector<4x8x1xf32>
      %c0_178 = arith.constant 0 : index
      %c0_179 = arith.constant 0 : index
      %c0_180 = arith.constant 0 : index
      %239 = vector.load %arg15[%c0_178, %c0_179, %c0_180] : memref<4x8x1xf32, #tpu.memory_space<vmem>>, vector<4x8x1xf32>
      tpu.vector_store %arg15[%c0_178, %c0_179, %c0_180], %238 {strides = array<i32>} : memref<4x8x1xf32, #tpu.memory_space<vmem>>, vector<4x8x1xf32>,
      %cst_181 = arith.constant 0.000000e+00 : f32
      %240 = vector.broadcast %cst_181 : f32 to vector<4x8x8xf32>
      %c0_182 = arith.constant 0 : index
      %c0_183 = arith.constant 0 : index
      %c0_184 = arith.constant 0 : index
      %241 = vector.load %arg16[%c0_182, %c0_183, %c0_184] : memref<4x8x8xf32, #tpu.memory_space<vmem>>, vector<4x8x8xf32>
      tpu.vector_store %arg16[%c0_182, %c0_183, %c0_184], %240 {strides = array<i32>} : memref<4x8x8xf32, #tpu.memory_space<vmem>>, vector<4x8x8xf32>,
    } else {
    }
    %c0 = arith.constant 0 : index
    %c0_1 = arith.constant 0 : index
    %c0_2 = arith.constant 0 : index
    %3 = vector.load %arg4[%c0, %c0_1, %c0_2] : memref<1x8x16xf32, #tpu.memory_space<vmem>>, vector<1x8x16xf32>
    %4 = vector.shape_cast %3 : vector<1x8x16xf32> to vector<8x16xf32>
    %5 = arith.truncf %4 : vector<8x16xf32> to vector<8x16xbf16>
    %c0_3 = arith.constant 0 : index
    %c0_4 = arith.constant 0 : index
    %c0_5 = arith.constant 0 : index
    %6 = vector.load %arg8[%c0_3, %c0_4, %c0_5] : memref<4x16x8xbf16, #tpu.memory_space<vmem>>, vector<1x16x8xbf16>
    %7 = vector.shape_cast %6 : vector<1x16x8xbf16> to vector<16x8xbf16>
    %cst = arith.constant dense<0.000000e+00> : vector<8x8xf32>
    %8 = tpu.matmul %5, %7, %cst {dimension_numbers = #tpu.dot_dimension_numbers<[1], [0], [0], [1], [0, 0, 1, 1], [], []>} : vector<8x16xbf16>, vector<16x8xbf16>, vector<8x8xf32> -> vector<8x8xf32>
    %9 = arith.truncf %8 : vector<8x8xf32> to vector<8x8xbf16>
    %c0_6 = arith.constant 0 : index
    %c0_7 = arith.constant 0 : index
    %c0_8 = arith.constant 0 : index
    %10 = vector.load %arg9[%c0_6, %c0_7, %c0_8] : memref<4x16x8xbf16, #tpu.memory_space<vmem>>, vector<1x16x8xbf16>
    %11 = vector.shape_cast %10 : vector<1x16x8xbf16> to vector<16x8xbf16>
    %cst_9 = arith.constant dense<0.000000e+00> : vector<8x8xf32>
    %12 = tpu.matmul %5, %11, %cst_9 {dimension_numbers = #tpu.dot_dimension_numbers<[1], [0], [0], [1], [0, 0, 1, 1], [], []>} : vector<8x16xbf16>, vector<16x8xbf16>, vector<8x8xf32> -> vector<8x8xf32>
    %13 = arith.truncf %12 : vector<8x8xf32> to vector<8x8xbf16>
    %c0_10 = arith.constant 0 : index
    %c0_11 = arith.constant 0 : index
    %c0_12 = arith.constant 0 : index
    %14 = vector.load %arg13[%c0_10, %c0_11, %c0_12] : memref<4x8x8xbf16, #tpu.memory_space<vmem>>, vector<1x8x8xbf16>
    %15 = vector.shape_cast %14 : vector<1x8x8xbf16> to vector<8x8xbf16>
    %cst_13 = arith.constant dense<0.000000e+00> : vector<8x8xf32>
    %16 = tpu.matmul %15, %9, %cst_13 {dimension_numbers = #tpu.dot_dimension_numbers<[1], [1], [0], [0], [0, 0, 1, 0], [], []>} : vector<8x8xbf16>, vector<8x8xbf16>, vector<8x8xf32> -> vector<8x8xf32>
    %c0_14 = arith.constant 0 : index
    %c0_15 = arith.constant 0 : index
    %c0_16 = arith.constant 0 : index
    %17 = vector.load %arg14[%c0_14, %c0_15, %c0_16] : memref<4x8x1xf32, #tpu.memory_space<vmem>>, vector<1x8x1xf32>
    %18 = vector.shape_cast %17 : vector<1x8x1xf32> to vector<8x1xf32>
    %cst_17 = arith.constant dense<0xFF800000> : vector<8xf32>
    %19 = vector.multi_reduction <maximumf>, %16, %cst_17 [1] : vector<8x8xf32> to vector<8xf32>
    %20 = vector.shape_cast %19 : vector<8xf32> to vector<8x1xf32>
    %21 = arith.maximumf %18, %20 : vector<8x1xf32>
    %22 = arith.subf %18, %21 : vector<8x1xf32>
    %23 = math.exp %22 : vector<8x1xf32>
    %24 = vector.broadcast %21 : vector<8x1xf32> to vector<8x8xf32>
    %25 = arith.subf %16, %24 : vector<8x8xf32>
    %26 = math.exp %25 : vector<8x8xf32>
    %c0_18 = arith.constant 0 : index
    %c0_19 = arith.constant 0 : index
    %c0_20 = arith.constant 0 : index
    %27 = vector.load %arg15[%c0_18, %c0_19, %c0_20] : memref<4x8x1xf32, #tpu.memory_space<vmem>>, vector<1x8x1xf32>
    %28 = vector.shape_cast %27 : vector<1x8x1xf32> to vector<8x1xf32>
    %29 = arith.mulf %23, %28 : vector<8x1xf32>
    %cst_21 = arith.constant dense<0.000000e+00> : vector<8xf32>
    %30 = vector.multi_reduction <add>, %26, %cst_21 [1] : vector<8x8xf32> to vector<8xf32>
    %31 = vector.shape_cast %30 : vector<8xf32> to vector<8x1xf32>
    %32 = arith.addf %29, %31 : vector<8x1xf32>
    %c0_22 = arith.constant 0 : index
    %c0_23 = arith.constant 0 : index
    %c0_24 = arith.constant 0 : index
    %33 = vector.load %arg15[%c0_22, %c0_23, %c0_24] : memref<4x8x1xf32, #tpu.memory_space<vmem>>, vector<1x8x1xf32>
    %34 = vector.shape_cast %33 : vector<1x8x1xf32> to vector<8x1xf32>
    %35 = vector.shape_cast %32 : vector<8x1xf32> to vector<1x8x1xf32>
    tpu.vector_store %arg15[%c0_22, %c0_23, %c0_24], %35 {strides = array<i32>} : memref<4x8x1xf32, #tpu.memory_space<vmem>>, vector<1x8x1xf32>,
    %c0_25 = arith.constant 0 : index
    %c0_26 = arith.constant 0 : index
    %c0_27 = arith.constant 0 : index
    %36 = vector.load %arg16[%c0_25, %c0_26, %c0_27] : memref<4x8x8xf32, #tpu.memory_space<vmem>>, vector<1x8x8xf32>
    %37 = vector.shape_cast %36 : vector<1x8x8xf32> to vector<8x8xf32>
    %38 = vector.broadcast %23 : vector<8x1xf32> to vector<8x8xf32>
    %39 = arith.mulf %38, %37 : vector<8x8xf32>
    %40 = arith.truncf %26 : vector<8x8xf32> to vector<8x8xbf16>
    %cst_28 = arith.constant dense<0.000000e+00> : vector<8x8xf32>
    %41 = tpu.matmul %40, %13, %cst_28 {dimension_numbers = #tpu.dot_dimension_numbers<[1], [0], [0], [1], [0, 0, 1, 1], [], []>} : vector<8x8xbf16>, vector<8x8xbf16>, vector<8x8xf32> -> vector<8x8xf32>
    %42 = arith.addf %39, %41 : vector<8x8xf32>
    %c0_29 = arith.constant 0 : index
    %c0_30 = arith.constant 0 : index
    %c0_31 = arith.constant 0 : index
    %43 = vector.load %arg16[%c0_29, %c0_30, %c0_31] : memref<4x8x8xf32, #tpu.memory_space<vmem>>, vector<1x8x8xf32>
    %44 = vector.shape_cast %43 : vector<1x8x8xf32> to vector<8x8xf32>
    %45 = vector.shape_cast %42 : vector<8x8xf32> to vector<1x8x8xf32>
    tpu.vector_store %arg16[%c0_29, %c0_30, %c0_31], %45 {strides = array<i32>} : memref<4x8x8xf32, #tpu.memory_space<vmem>>, vector<1x8x8xf32>,
    %c0_32 = arith.constant 0 : index
    %c0_33 = arith.constant 0 : index
    %c0_34 = arith.constant 0 : index
    %46 = vector.load %arg14[%c0_32, %c0_33, %c0_34] : memref<4x8x1xf32, #tpu.memory_space<vmem>>, vector<1x8x1xf32>
    %47 = vector.shape_cast %46 : vector<1x8x1xf32> to vector<8x1xf32>
    %48 = vector.shape_cast %21 : vector<8x1xf32> to vector<1x8x1xf32>
    tpu.vector_store %arg14[%c0_32, %c0_33, %c0_34], %48 {strides = array<i32>} : memref<4x8x1xf32, #tpu.memory_space<vmem>>, vector<1x8x1xf32>,
    %c1 = arith.constant 1 : index
    %c0_35 = arith.constant 0 : index
    %c0_36 = arith.constant 0 : index
    %49 = vector.load %arg8[%c1, %c0_35, %c0_36] : memref<4x16x8xbf16, #tpu.memory_space<vmem>>, vector<1x16x8xbf16>
    %50 = vector.shape_cast %49 : vector<1x16x8xbf16> to vector<16x8xbf16>
    %cst_37 = arith.constant dense<0.000000e+00> : vector<8x8xf32>
    %51 = tpu.matmul %5, %50, %cst_37 {dimension_numbers = #tpu.dot_dimension_numbers<[1], [0], [0], [1], [0, 0, 1, 1], [], []>} : vector<8x16xbf16>, vector<16x8xbf16>, vector<8x8xf32> -> vector<8x8xf32>
    %52 = arith.truncf %51 : vector<8x8xf32> to vector<8x8xbf16>
    %c1_38 = arith.constant 1 : index
    %c0_39 = arith.constant 0 : index
    %c0_40 = arith.constant 0 : index
    %53 = vector.load %arg9[%c1_38, %c0_39, %c0_40] : memref<4x16x8xbf16, #tpu.memory_space<vmem>>, vector<1x16x8xbf16>
    %54 = vector.shape_cast %53 : vector<1x16x8xbf16> to vector<16x8xbf16>
    %cst_41 = arith.constant dense<0.000000e+00> : vector<8x8xf32>
    %55 = tpu.matmul %5, %54, %cst_41 {dimension_numbers = #tpu.dot_dimension_numbers<[1], [0], [0], [1], [0, 0, 1, 1], [], []>} : vector<8x16xbf16>, vector<16x8xbf16>, vector<8x8xf32> -> vector<8x8xf32>
    %56 = arith.truncf %55 : vector<8x8xf32> to vector<8x8xbf16>
    %c1_42 = arith.constant 1 : index
    %c0_43 = arith.constant 0 : index
    %c0_44 = arith.constant 0 : index
    %57 = vector.load %arg13[%c1_42, %c0_43, %c0_44] : memref<4x8x8xbf16, #tpu.memory_space<vmem>>, vector<1x8x8xbf16>
    %58 = vector.shape_cast %57 : vector<1x8x8xbf16> to vector<8x8xbf16>
    %cst_45 = arith.constant dense<0.000000e+00> : vector<8x8xf32>
    %59 = tpu.matmul %58, %52, %cst_45 {dimension_numbers = #tpu.dot_dimension_numbers<[1], [1], [0], [0], [0, 0, 1, 0], [], []>} : vector<8x8xbf16>, vector<8x8xbf16>, vector<8x8xf32> -> vector<8x8xf32>
    %c1_46 = arith.constant 1 : index
    %c0_47 = arith.constant 0 : index
    %c0_48 = arith.constant 0 : index
    %60 = vector.load %arg14[%c1_46, %c0_47, %c0_48] : memref<4x8x1xf32, #tpu.memory_space<vmem>>, vector<1x8x1xf32>
    %61 = vector.shape_cast %60 : vector<1x8x1xf32> to vector<8x1xf32>
    %cst_49 = arith.constant dense<0xFF800000> : vector<8xf32>
    %62 = vector.multi_reduction <maximumf>, %59, %cst_49 [1] : vector<8x8xf32> to vector<8xf32>
    %63 = vector.shape_cast %62 : vector<8xf32> to vector<8x1xf32>
    %64 = arith.maximumf %61, %63 : vector<8x1xf32>
    %65 = arith.subf %61, %64 : vector<8x1xf32>
    %66 = math.exp %65 : vector<8x1xf32>
    %67 = vector.broadcast %64 : vector<8x1xf32> to vector<8x8xf32>
    %68 = arith.subf %59, %67 : vector<8x8xf32>
    %69 = math.exp %68 : vector<8x8xf32>
    %c1_50 = arith.constant 1 : index
    %c0_51 = arith.constant 0 : index
    %c0_52 = arith.constant 0 : index
    %70 = vector.load %arg15[%c1_50, %c0_51, %c0_52] : memref<4x8x1xf32, #tpu.memory_space<vmem>>, vector<1x8x1xf32>
    %71 = vector.shape_cast %70 : vector<1x8x1xf32> to vector<8x1xf32>
    %72 = arith.mulf %66, %71 : vector<8x1xf32>
    %cst_53 = arith.constant dense<0.000000e+00> : vector<8xf32>
    %73 = vector.multi_reduction <add>, %69, %cst_53 [1] : vector<8x8xf32> to vector<8xf32>
    %74 = vector.shape_cast %73 : vector<8xf32> to vector<8x1xf32>
    %75 = arith.addf %72, %74 : vector<8x1xf32>
    %c1_54 = arith.constant 1 : index
    %c0_55 = arith.constant 0 : index
    %c0_56 = arith.constant 0 : index
    %76 = vector.load %arg15[%c1_54, %c0_55, %c0_56] : memref<4x8x1xf32, #tpu.memory_space<vmem>>, vector<1x8x1xf32>
    %77 = vector.shape_cast %76 : vector<1x8x1xf32> to vector<8x1xf32>
    %78 = vector.shape_cast %75 : vector<8x1xf32> to vector<1x8x1xf32>
    tpu.vector_store %arg15[%c1_54, %c0_55, %c0_56], %78 {strides = array<i32>} : memref<4x8x1xf32, #tpu.memory_space<vmem>>, vector<1x8x1xf32>,
    %c1_57 = arith.constant 1 : index
    %c0_58 = arith.constant 0 : index
    %c0_59 = arith.constant 0 : index
    %79 = vector.load %arg16[%c1_57, %c0_58, %c0_59] : memref<4x8x8xf32, #tpu.memory_space<vmem>>, vector<1x8x8xf32>
    %80 = vector.shape_cast %79 : vector<1x8x8xf32> to vector<8x8xf32>
    %81 = vector.broadcast %66 : vector<8x1xf32> to vector<8x8xf32>
    %82 = arith.mulf %81, %80 : vector<8x8xf32>
    %83 = arith.truncf %69 : vector<8x8xf32> to vector<8x8xbf16>
    %cst_60 = arith.constant dense<0.000000e+00> : vector<8x8xf32>
    %84 = tpu.matmul %83, %56, %cst_60 {dimension_numbers = #tpu.dot_dimension_numbers<[1], [0], [0], [1], [0, 0, 1, 1], [], []>} : vector<8x8xbf16>, vector<8x8xbf16>, vector<8x8xf32> -> vector<8x8xf32>
    %85 = arith.addf %82, %84 : vector<8x8xf32>
    %c1_61 = arith.constant 1 : index
    %c0_62 = arith.constant 0 : index
    %c0_63 = arith.constant 0 : index
    %86 = vector.load %arg16[%c1_61, %c0_62, %c0_63] : memref<4x8x8xf32, #tpu.memory_space<vmem>>, vector<1x8x8xf32>
    %87 = vector.shape_cast %86 : vector<1x8x8xf32> to vector<8x8xf32>
    %88 = vector.shape_cast %85 : vector<8x8xf32> to vector<1x8x8xf32>
    tpu.vector_store %arg16[%c1_61, %c0_62, %c0_63], %88 {strides = array<i32>} : memref<4x8x8xf32, #tpu.memory_space<vmem>>, vector<1x8x8xf32>,
    %c1_64 = arith.constant 1 : index
    %c0_65 = arith.constant 0 : index
    %c0_66 = arith.constant 0 : index
    %89 = vector.load %arg14[%c1_64, %c0_65, %c0_66] : memref<4x8x1xf32, #tpu.memory_space<vmem>>, vector<1x8x1xf32>
    %90 = vector.shape_cast %89 : vector<1x8x1xf32> to vector<8x1xf32>
    %91 = vector.shape_cast %64 : vector<8x1xf32> to vector<1x8x1xf32>
    tpu.vector_store %arg14[%c1_64, %c0_65, %c0_66], %91 {strides = array<i32>} : memref<4x8x1xf32, #tpu.memory_space<vmem>>, vector<1x8x1xf32>,
    %c2 = arith.constant 2 : index
    %c0_67 = arith.constant 0 : index
    %c0_68 = arith.constant 0 : index
    %92 = vector.load %arg8[%c2, %c0_67, %c0_68] : memref<4x16x8xbf16, #tpu.memory_space<vmem>>, vector<1x16x8xbf16>
    %93 = vector.shape_cast %92 : vector<1x16x8xbf16> to vector<16x8xbf16>
    %cst_69 = arith.constant dense<0.000000e+00> : vector<8x8xf32>
    %94 = tpu.matmul %5, %93, %cst_69 {dimension_numbers = #tpu.dot_dimension_numbers<[1], [0], [0], [1], [0, 0, 1, 1], [], []>} : vector<8x16xbf16>, vector<16x8xbf16>, vector<8x8xf32> -> vector<8x8xf32>
    %95 = arith.truncf %94 : vector<8x8xf32> to vector<8x8xbf16>
    %c2_70 = arith.constant 2 : index
    %c0_71 = arith.constant 0 : index
    %c0_72 = arith.constant 0 : index
    %96 = vector.load %arg9[%c2_70, %c0_71, %c0_72] : memref<4x16x8xbf16, #tpu.memory_space<vmem>>, vector<1x16x8xbf16>
    %97 = vector.shape_cast %96 : vector<1x16x8xbf16> to vector<16x8xbf16>
    %cst_73 = arith.constant dense<0.000000e+00> : vector<8x8xf32>
    %98 = tpu.matmul %5, %97, %cst_73 {dimension_numbers = #tpu.dot_dimension_numbers<[1], [0], [0], [1], [0, 0, 1, 1], [], []>} : vector<8x16xbf16>, vector<16x8xbf16>, vector<8x8xf32> -> vector<8x8xf32>
    %99 = arith.truncf %98 : vector<8x8xf32> to vector<8x8xbf16>
    %c2_74 = arith.constant 2 : index
    %c0_75 = arith.constant 0 : index
    %c0_76 = arith.constant 0 : index
    %100 = vector.load %arg13[%c2_74, %c0_75, %c0_76] : memref<4x8x8xbf16, #tpu.memory_space<vmem>>, vector<1x8x8xbf16>
    %101 = vector.shape_cast %100 : vector<1x8x8xbf16> to vector<8x8xbf16>
    %cst_77 = arith.constant dense<0.000000e+00> : vector<8x8xf32>
    %102 = tpu.matmul %101, %95, %cst_77 {dimension_numbers = #tpu.dot_dimension_numbers<[1], [1], [0], [0], [0, 0, 1, 0], [], []>} : vector<8x8xbf16>, vector<8x8xbf16>, vector<8x8xf32> -> vector<8x8xf32>
    %c2_78 = arith.constant 2 : index
    %c0_79 = arith.constant 0 : index
    %c0_80 = arith.constant 0 : index
    %103 = vector.load %arg14[%c2_78, %c0_79, %c0_80] : memref<4x8x1xf32, #tpu.memory_space<vmem>>, vector<1x8x1xf32>
    %104 = vector.shape_cast %103 : vector<1x8x1xf32> to vector<8x1xf32>
    %cst_81 = arith.constant dense<0xFF800000> : vector<8xf32>
    %105 = vector.multi_reduction <maximumf>, %102, %cst_81 [1] : vector<8x8xf32> to vector<8xf32>
    %106 = vector.shape_cast %105 : vector<8xf32> to vector<8x1xf32>
    %107 = arith.maximumf %104, %106 : vector<8x1xf32>
    %108 = arith.subf %104, %107 : vector<8x1xf32>
    %109 = math.exp %108 : vector<8x1xf32>
    %110 = vector.broadcast %107 : vector<8x1xf32> to vector<8x8xf32>
    %111 = arith.subf %102, %110 : vector<8x8xf32>
    %112 = math.exp %111 : vector<8x8xf32>
    %c2_82 = arith.constant 2 : index
    %c0_83 = arith.constant 0 : index
    %c0_84 = arith.constant 0 : index
    %113 = vector.load %arg15[%c2_82, %c0_83, %c0_84] : memref<4x8x1xf32, #tpu.memory_space<vmem>>, vector<1x8x1xf32>
    %114 = vector.shape_cast %113 : vector<1x8x1xf32> to vector<8x1xf32>
    %115 = arith.mulf %109, %114 : vector<8x1xf32>
    %cst_85 = arith.constant dense<0.000000e+00> : vector<8xf32>
    %116 = vector.multi_reduction <add>, %112, %cst_85 [1] : vector<8x8xf32> to vector<8xf32>
    %117 = vector.shape_cast %116 : vector<8xf32> to vector<8x1xf32>
    %118 = arith.addf %115, %117 : vector<8x1xf32>
    %c2_86 = arith.constant 2 : index
    %c0_87 = arith.constant 0 : index
    %c0_88 = arith.constant 0 : index
    %119 = vector.load %arg15[%c2_86, %c0_87, %c0_88] : memref<4x8x1xf32, #tpu.memory_space<vmem>>, vector<1x8x1xf32>
    %120 = vector.shape_cast %119 : vector<1x8x1xf32> to vector<8x1xf32>
    %121 = vector.shape_cast %118 : vector<8x1xf32> to vector<1x8x1xf32>
    tpu.vector_store %arg15[%c2_86, %c0_87, %c0_88], %121 {strides = array<i32>} : memref<4x8x1xf32, #tpu.memory_space<vmem>>, vector<1x8x1xf32>,
    %c2_89 = arith.constant 2 : index
    %c0_90 = arith.constant 0 : index
    %c0_91 = arith.constant 0 : index
    %122 = vector.load %arg16[%c2_89, %c0_90, %c0_91] : memref<4x8x8xf32, #tpu.memory_space<vmem>>, vector<1x8x8xf32>
    %123 = vector.shape_cast %122 : vector<1x8x8xf32> to vector<8x8xf32>
    %124 = vector.broadcast %109 : vector<8x1xf32> to vector<8x8xf32>
    %125 = arith.mulf %124, %123 : vector<8x8xf32>
    %126 = arith.truncf %112 : vector<8x8xf32> to vector<8x8xbf16>
    %cst_92 = arith.constant dense<0.000000e+00> : vector<8x8xf32>
    %127 = tpu.matmul %126, %99, %cst_92 {dimension_numbers = #tpu.dot_dimension_numbers<[1], [0], [0], [1], [0, 0, 1, 1], [], []>} : vector<8x8xbf16>, vector<8x8xbf16>, vector<8x8xf32> -> vector<8x8xf32>
    %128 = arith.addf %125, %127 : vector<8x8xf32>
    %c2_93 = arith.constant 2 : index
    %c0_94 = arith.constant 0 : index
    %c0_95 = arith.constant 0 : index
    %129 = vector.load %arg16[%c2_93, %c0_94, %c0_95] : memref<4x8x8xf32, #tpu.memory_space<vmem>>, vector<1x8x8xf32>
    %130 = vector.shape_cast %129 : vector<1x8x8xf32> to vector<8x8xf32>
    %131 = vector.shape_cast %128 : vector<8x8xf32> to vector<1x8x8xf32>
    tpu.vector_store %arg16[%c2_93, %c0_94, %c0_95], %131 {strides = array<i32>} : memref<4x8x8xf32, #tpu.memory_space<vmem>>, vector<1x8x8xf32>,
    %c2_96 = arith.constant 2 : index
    %c0_97 = arith.constant 0 : index
    %c0_98 = arith.constant 0 : index
    %132 = vector.load %arg14[%c2_96, %c0_97, %c0_98] : memref<4x8x1xf32, #tpu.memory_space<vmem>>, vector<1x8x1xf32>
    %133 = vector.shape_cast %132 : vector<1x8x1xf32> to vector<8x1xf32>
    %134 = vector.shape_cast %107 : vector<8x1xf32> to vector<1x8x1xf32>
    tpu.vector_store %arg14[%c2_96, %c0_97, %c0_98], %134 {strides = array<i32>} : memref<4x8x1xf32, #tpu.memory_space<vmem>>, vector<1x8x1xf32>,
    %c3 = arith.constant 3 : index
    %c0_99 = arith.constant 0 : index
    %c0_100 = arith.constant 0 : index
    %135 = vector.load %arg8[%c3, %c0_99, %c0_100] : memref<4x16x8xbf16, #tpu.memory_space<vmem>>, vector<1x16x8xbf16>
    %136 = vector.shape_cast %135 : vector<1x16x8xbf16> to vector<16x8xbf16>
    %cst_101 = arith.constant dense<0.000000e+00> : vector<8x8xf32>
    %137 = tpu.matmul %5, %136, %cst_101 {dimension_numbers = #tpu.dot_dimension_numbers<[1], [0], [0], [1], [0, 0, 1, 1], [], []>} : vector<8x16xbf16>, vector<16x8xbf16>, vector<8x8xf32> -> vector<8x8xf32>
    %138 = arith.truncf %137 : vector<8x8xf32> to vector<8x8xbf16>
    %c3_102 = arith.constant 3 : index
    %c0_103 = arith.constant 0 : index
    %c0_104 = arith.constant 0 : index
    %139 = vector.load %arg9[%c3_102, %c0_103, %c0_104] : memref<4x16x8xbf16, #tpu.memory_space<vmem>>, vector<1x16x8xbf16>
    %140 = vector.shape_cast %139 : vector<1x16x8xbf16> to vector<16x8xbf16>
    %cst_105 = arith.constant dense<0.000000e+00> : vector<8x8xf32>
    %141 = tpu.matmul %5, %140, %cst_105 {dimension_numbers = #tpu.dot_dimension_numbers<[1], [0], [0], [1], [0, 0, 1, 1], [], []>} : vector<8x16xbf16>, vector<16x8xbf16>, vector<8x8xf32> -> vector<8x8xf32>
    %142 = arith.truncf %141 : vector<8x8xf32> to vector<8x8xbf16>
    %c3_106 = arith.constant 3 : index
    %c0_107 = arith.constant 0 : index
    %c0_108 = arith.constant 0 : index
    %143 = vector.load %arg13[%c3_106, %c0_107, %c0_108] : memref<4x8x8xbf16, #tpu.memory_space<vmem>>, vector<1x8x8xbf16>
    %144 = vector.shape_cast %143 : vector<1x8x8xbf16> to vector<8x8xbf16>
    %cst_109 = arith.constant dense<0.000000e+00> : vector<8x8xf32>
    %145 = tpu.matmul %144, %138, %cst_109 {dimension_numbers = #tpu.dot_dimension_numbers<[1], [1], [0], [0], [0, 0, 1, 0], [], []>} : vector<8x8xbf16>, vector<8x8xbf16>, vector<8x8xf32> -> vector<8x8xf32>
    %c3_110 = arith.constant 3 : index
    %c0_111 = arith.constant 0 : index
    %c0_112 = arith.constant 0 : index
    %146 = vector.load %arg14[%c3_110, %c0_111, %c0_112] : memref<4x8x1xf32, #tpu.memory_space<vmem>>, vector<1x8x1xf32>
    %147 = vector.shape_cast %146 : vector<1x8x1xf32> to vector<8x1xf32>
    %cst_113 = arith.constant dense<0xFF800000> : vector<8xf32>
    %148 = vector.multi_reduction <maximumf>, %145, %cst_113 [1] : vector<8x8xf32> to vector<8xf32>
    %149 = vector.shape_cast %148 : vector<8xf32> to vector<8x1xf32>
    %150 = arith.maximumf %147, %149 : vector<8x1xf32>
    %151 = arith.subf %147, %150 : vector<8x1xf32>
    %152 = math.exp %151 : vector<8x1xf32>
    %153 = vector.broadcast %150 : vector<8x1xf32> to vector<8x8xf32>
    %154 = arith.subf %145, %153 : vector<8x8xf32>
    %155 = math.exp %154 : vector<8x8xf32>
    %c3_114 = arith.constant 3 : index
    %c0_115 = arith.constant 0 : index
    %c0_116 = arith.constant 0 : index
    %156 = vector.load %arg15[%c3_114, %c0_115, %c0_116] : memref<4x8x1xf32, #tpu.memory_space<vmem>>, vector<1x8x1xf32>
    %157 = vector.shape_cast %156 : vector<1x8x1xf32> to vector<8x1xf32>
    %158 = arith.mulf %152, %157 : vector<8x1xf32>
    %cst_117 = arith.constant dense<0.000000e+00> : vector<8xf32>
    %159 = vector.multi_reduction <add>, %155, %cst_117 [1] : vector<8x8xf32> to vector<8xf32>
    %160 = vector.shape_cast %159 : vector<8xf32> to vector<8x1xf32>
    %161 = arith.addf %158, %160 : vector<8x1xf32>
    %c3_118 = arith.constant 3 : index
    %c0_119 = arith.constant 0 : index
    %c0_120 = arith.constant 0 : index
    %162 = vector.load %arg15[%c3_118, %c0_119, %c0_120] : memref<4x8x1xf32, #tpu.memory_space<vmem>>, vector<1x8x1xf32>
    %163 = vector.shape_cast %162 : vector<1x8x1xf32> to vector<8x1xf32>
    %164 = vector.shape_cast %161 : vector<8x1xf32> to vector<1x8x1xf32>
    tpu.vector_store %arg15[%c3_118, %c0_119, %c0_120], %164 {strides = array<i32>} : memref<4x8x1xf32, #tpu.memory_space<vmem>>, vector<1x8x1xf32>,
    %c3_121 = arith.constant 3 : index
    %c0_122 = arith.constant 0 : index
    %c0_123 = arith.constant 0 : index
    %165 = vector.load %arg16[%c3_121, %c0_122, %c0_123] : memref<4x8x8xf32, #tpu.memory_space<vmem>>, vector<1x8x8xf32>
    %166 = vector.shape_cast %165 : vector<1x8x8xf32> to vector<8x8xf32>
    %167 = vector.broadcast %152 : vector<8x1xf32> to vector<8x8xf32>
    %168 = arith.mulf %167, %166 : vector<8x8xf32>
    %169 = arith.truncf %155 : vector<8x8xf32> to vector<8x8xbf16>
    %cst_124 = arith.constant dense<0.000000e+00> : vector<8x8xf32>
    %170 = tpu.matmul %169, %142, %cst_124 {dimension_numbers = #tpu.dot_dimension_numbers<[1], [0], [0], [1], [0, 0, 1, 1], [], []>} : vector<8x8xbf16>, vector<8x8xbf16>, vector<8x8xf32> -> vector<8x8xf32>
    %171 = arith.addf %168, %170 : vector<8x8xf32>
    %c3_125 = arith.constant 3 : index
    %c0_126 = arith.constant 0 : index
    %c0_127 = arith.constant 0 : index
    %172 = vector.load %arg16[%c3_125, %c0_126, %c0_127] : memref<4x8x8xf32, #tpu.memory_space<vmem>>, vector<1x8x8xf32>
    %173 = vector.shape_cast %172 : vector<1x8x8xf32> to vector<8x8xf32>
    %174 = vector.shape_cast %171 : vector<8x8xf32> to vector<1x8x8xf32>
    tpu.vector_store %arg16[%c3_125, %c0_126, %c0_127], %174 {strides = array<i32>} : memref<4x8x8xf32, #tpu.memory_space<vmem>>, vector<1x8x8xf32>,
    %c3_128 = arith.constant 3 : index
    %c0_129 = arith.constant 0 : index
    %c0_130 = arith.constant 0 : index
    %175 = vector.load %arg14[%c3_128, %c0_129, %c0_130] : memref<4x8x1xf32, #tpu.memory_space<vmem>>, vector<1x8x1xf32>
    %176 = vector.shape_cast %175 : vector<1x8x1xf32> to vector<8x1xf32>
    %177 = vector.shape_cast %150 : vector<8x1xf32> to vector<1x8x1xf32>
    tpu.vector_store %arg14[%c3_128, %c0_129, %c0_130], %177 {strides = array<i32>} : memref<4x8x1xf32, #tpu.memory_space<vmem>>, vector<1x8x1xf32>,
    %c0_i32_131 = arith.constant 0 : i32
    %178 = arith.cmpi eq, %arg2, %c0_i32_131 : i32
    %179 = arith.extui %178 : i1 to i32
    %c0_i32_132 = arith.constant 0 : i32
    %180 = arith.cmpi ne, %179, %c0_i32_132 : i32
    scf.if %180 {
      %c0_133 = arith.constant 0 : index
      %c0_134 = arith.constant 0 : index
      %c0_135 = arith.constant 0 : index
      %181 = vector.load %arg16[%c0_133, %c0_134, %c0_135] : memref<4x8x8xf32, #tpu.memory_space<vmem>>, vector<1x8x8xf32>
      %182 = vector.shape_cast %181 : vector<1x8x8xf32> to vector<8x8xf32>
      %c0_136 = arith.constant 0 : index
      %c0_137 = arith.constant 0 : index
      %c0_138 = arith.constant 0 : index
      %183 = vector.load %arg15[%c0_136, %c0_137, %c0_138] : memref<4x8x1xf32, #tpu.memory_space<vmem>>, vector<1x8x1xf32>
      %184 = vector.shape_cast %183 : vector<1x8x1xf32> to vector<8x1xf32>
      %185 = vector.broadcast %184 : vector<8x1xf32> to vector<8x8xf32>
      %186 = arith.divf %182, %185 : vector<8x8xf32>
      %c0_139 = arith.constant 0 : index
      %c0_140 = arith.constant 0 : index
      %187 = vector.load %arg17[%c0_139, %c0_140] : memref<8x32xf32, #tpu.memory_space<vmem>>, vector<8x8xf32>
      tpu.vector_store %arg17[%c0_139, %c0_140], %186 {strides = array<i32>} : memref<8x32xf32, #tpu.memory_space<vmem>>, vector<8x8xf32>,
      %c1_141 = arith.constant 1 : index
      %c0_142 = arith.constant 0 : index
      %c0_143 = arith.constant 0 : index
      %188 = vector.load %arg16[%c1_141, %c0_142, %c0_143] : memref<4x8x8xf32, #tpu.memory_space<vmem>>, vector<1x8x8xf32>
      %189 = vector.shape_cast %188 : vector<1x8x8xf32> to vector<8x8xf32>
      %c1_144 = arith.constant 1 : index
      %c0_145 = arith.constant 0 : index
      %c0_146 = arith.constant 0 : index
      %190 = vector.load %arg15[%c1_144, %c0_145, %c0_146] : memref<4x8x1xf32, #tpu.memory_space<vmem>>, vector<1x8x1xf32>
      %191 = vector.shape_cast %190 : vector<1x8x1xf32> to vector<8x1xf32>
      %192 = vector.broadcast %191 : vector<8x1xf32> to vector<8x8xf32>
      %193 = arith.divf %189, %192 : vector<8x8xf32>
      %c0_147 = arith.constant 0 : index
      %c8 = arith.constant 8 : index
      %194 = vector.load %arg17[%c0_147, %c8] : memref<8x32xf32, #tpu.memory_space<vmem>>, vector<8x8xf32>
      tpu.vector_store %arg17[%c0_147, %c8], %193 {strides = array<i32>} : memref<8x32xf32, #tpu.memory_space<vmem>>, vector<8x8xf32>,
      %c2_148 = arith.constant 2 : index
      %c0_149 = arith.constant 0 : index
      %c0_150 = arith.constant 0 : index
      %195 = vector.load %arg16[%c2_148, %c0_149, %c0_150] : memref<4x8x8xf32, #tpu.memory_space<vmem>>, vector<1x8x8xf32>
      %196 = vector.shape_cast %195 : vector<1x8x8xf32> to vector<8x8xf32>
      %c2_151 = arith.constant 2 : index
      %c0_152 = arith.constant 0 : index
      %c0_153 = arith.constant 0 : index
      %197 = vector.load %arg15[%c2_151, %c0_152, %c0_153] : memref<4x8x1xf32, #tpu.memory_space<vmem>>, vector<1x8x1xf32>
      %198 = vector.shape_cast %197 : vector<1x8x1xf32> to vector<8x1xf32>
      %199 = vector.broadcast %198 : vector<8x1xf32> to vector<8x8xf32>
      %200 = arith.divf %196, %199 : vector<8x8xf32>
      %c0_154 = arith.constant 0 : index
      %c16 = arith.constant 16 : index
      %201 = vector.load %arg17[%c0_154, %c16] : memref<8x32xf32, #tpu.memory_space<vmem>>, vector<8x8xf32>
      tpu.vector_store %arg17[%c0_154, %c16], %200 {strides = array<i32>} : memref<8x32xf32, #tpu.memory_space<vmem>>, vector<8x8xf32>,
      %c3_155 = arith.constant 3 : index
      %c0_156 = arith.constant 0 : index
      %c0_157 = arith.constant 0 : index
      %202 = vector.load %arg16[%c3_155, %c0_156, %c0_157] : memref<4x8x8xf32, #tpu.memory_space<vmem>>, vector<1x8x8xf32>
      %203 = vector.shape_cast %202 : vector<1x8x8xf32> to vector<8x8xf32>
      %c3_158 = arith.constant 3 : index
      %c0_159 = arith.constant 0 : index
      %c0_160 = arith.constant 0 : index
      %204 = vector.load %arg15[%c3_158, %c0_159, %c0_160] : memref<4x8x1xf32, #tpu.memory_space<vmem>>, vector<1x8x1xf32>
      %205 = vector.shape_cast %204 : vector<1x8x1xf32> to vector<8x1xf32>
      %206 = vector.broadcast %205 : vector<8x1xf32> to vector<8x8xf32>
      %207 = arith.divf %203, %206 : vector<8x8xf32>
      %c0_161 = arith.constant 0 : index
      %c24 = arith.constant 24 : index
      %208 = vector.load %arg17[%c0_161, %c24] : memref<8x32xf32, #tpu.memory_space<vmem>>, vector<8x8xf32>
      tpu.vector_store %arg17[%c0_161, %c24], %207 {strides = array<i32>} : memref<8x32xf32, #tpu.memory_space<vmem>>, vector<8x8xf32>,
      %c0_162 = arith.constant 0 : index
      %c0_163 = arith.constant 0 : index
      %209 = vector.load %arg17[%c0_162, %c0_163] : memref<8x32xf32, #tpu.memory_space<vmem>>, vector<8x32xf32>
      %210 = arith.truncf %209 : vector<8x32xf32> to vector<8x32xbf16>
      %c0_164 = arith.constant 0 : index
      %c0_165 = arith.constant 0 : index
      %211 = vector.load %arg10[%c0_164, %c0_165] : memref<32x32xbf16, #tpu.memory_space<vmem>>, vector<32x32xbf16>
      %cst_166 = arith.constant dense<0.000000e+00> : vector<8x32xf32>
      %212 = tpu.matmul %210, %211, %cst_166 {dimension_numbers = #tpu.dot_dimension_numbers<[1], [0], [0], [1], [0, 0, 1, 1], [], []>} : vector<8x32xbf16>, vector<32x32xbf16>, vector<8x32xf32> -> vector<8x32xf32>
      %c0_167 = arith.constant 0 : index
      %c0_168 = arith.constant 0 : index
      %c0_169 = arith.constant 0 : index
      %213 = vector.load %arg3[%c0_167, %c0_168, %c0_169] : memref<1x8x32xf32, #tpu.memory_space<vmem>>, vector<1x8x32xf32>
      %214 = vector.shape_cast %213 : vector<1x8x32xf32> to vector<8x32xf32>
      %215 = arith.addf %214, %212 : vector<8x32xf32>
      %c0_170 = arith.constant 0 : index
      %c0_171 = arith.constant 0 : index
      %216 = vector.load %arg11[%c0_170, %c0_171] : memref<1x32xf32, #tpu.memory_space<vmem>>, vector<1x32xf32>
      %217 = vector.broadcast %216 : vector<1x32xf32> to vector<8x32xf32>
      %218 = arith.addf %215, %217 : vector<8x32xf32>
      %c0_172 = arith.constant 0 : index
      %c0_173 = arith.constant 0 : index
      %c0_174 = arith.constant 0 : index
      %219 = vector.load %arg12[%c0_172, %c0_173, %c0_174] : memref<1x8x32xf32, #tpu.memory_space<vmem>>, vector<1x8x32xf32>
      %220 = vector.shape_cast %219 : vector<1x8x32xf32> to vector<8x32xf32>
      %221 = vector.shape_cast %218 : vector<8x32xf32> to vector<1x8x32xf32>
      tpu.vector_store %arg12[%c0_172, %c0_173, %c0_174], %221 {strides = array<i32>} : memref<1x8x32xf32, #tpu.memory_space<vmem>>, vector<1x8x32xf32>,
    } else {
    }
    return
  }
  func.func @transform_0(%arg0: i32, %arg1: i32, %arg2: i32) -> (i32, i32, i32) {
    %c0_i32 = arith.constant 0 : i32
    %c0_i32_0 = arith.constant 0 : i32
    return %arg0, %arg1, %c0_i32 : i32, i32, i32
  }
  func.func @transform_1(%arg0: i32, %arg1: i32, %arg2: i32) -> (i32, i32, i32) {
    %c0_i32 = arith.constant 0 : i32
    %c0_i32_0 = arith.constant 0 : i32
    return %arg0, %arg2, %c0_i32 : i32, i32, i32
  }
  func.func @transform_2(%arg0: i32, %arg1: i32, %arg2: i32) -> (i32, i32) {
    %c0_i32 = arith.constant 0 : i32
    %c0_i32_0 = arith.constant 0 : i32
    %c0_i32_1 = arith.constant 0 : i32
    return %c0_i32, %c0_i32_0 : i32, i32
  }
  func.func @transform_3(%arg0: i32, %arg1: i32, %arg2: i32) -> (i32, i32) {
    %c0_i32 = arith.constant 0 : i32
    %c0_i32_0 = arith.constant 0 : i32
    %c0_i32_1 = arith.constant 0 : i32
    return %c0_i32, %c0_i32_0 : i32, i32
  }
  func.func @transform_4(%arg0: i32, %arg1: i32, %arg2: i32) -> (i32, i32, i32) {
    %c0_i32 = arith.constant 0 : i32
    %c0_i32_0 = arith.constant 0 : i32
    %c0_i32_1 = arith.constant 0 : i32
    %c0_i32_2 = arith.constant 0 : i32
    return %c0_i32, %c0_i32_0, %c0_i32_1 : i32, i32, i32
  }
  func.func @transform_5(%arg0: i32, %arg1: i32, %arg2: i32) -> (i32, i32, i32) {
    %c0_i32 = arith.constant 0 : i32
    %c0_i32_0 = arith.constant 0 : i32
    %c0_i32_1 = arith.constant 0 : i32
    %c0_i32_2 = arith.constant 0 : i32
    return %c0_i32, %c0_i32_0, %c0_i32_1 : i32, i32, i32
  }
  func.func @transform_6(%arg0: i32, %arg1: i32, %arg2: i32) -> (i32, i32, i32) {
    %c0_i32 = arith.constant 0 : i32
    %c0_i32_0 = arith.constant 0 : i32
    %c0_i32_1 = arith.constant 0 : i32
    %c0_i32_2 = arith.constant 0 : i32
    return %c0_i32, %c0_i32_0, %c0_i32_1 : i32, i32, i32
  }
  func.func @transform_7(%arg0: i32, %arg1: i32, %arg2: i32) -> (i32, i32) {
    %c0_i32 = arith.constant 0 : i32
    %c0_i32_0 = arith.constant 0 : i32
    %c0_i32_1 = arith.constant 0 : i32
    return %c0_i32, %c0_i32_0 : i32, i32
  }
  func.func @transform_8(%arg0: i32, %arg1: i32, %arg2: i32) -> (i32, i32) {
    %c0_i32 = arith.constant 0 : i32
    %c0_i32_0 = arith.constant 0 : i32
    %c0_i32_1 = arith.constant 0 : i32
    return %c0_i32, %c0_i32_0 : i32, i32
  }
  func.func @transform_9(%arg0: i32, %arg1: i32, %arg2: i32) -> (i32, i32, i32) {
    %c0_i32 = arith.constant 0 : i32
    %c0_i32_0 = arith.constant 0 : i32
    return %arg0, %arg1, %c0_i32 : i32, i32, i32
  }
}

module attributes {stable_mosaic.version = 11 : i64} {
  func.func @_mlp_kernel(%arg0: i32, %arg1: i32, %arg2: memref<16x32xf32, #tpu.memory_space<vmem>>, %arg3: memref<1x32xf32, #tpu.memory_space<vmem>>, %arg4: memref<1x32xf32, #tpu.memory_space<vmem>>, %arg5: memref<32x128xbf16, #tpu.memory_space<vmem>>, %arg6: memref<1x128xf32, #tpu.memory_space<vmem>>, %arg7: memref<128x32xbf16, #tpu.memory_space<vmem>>, %arg8: memref<1x32xf32, #tpu.memory_space<vmem>>, %arg9: memref<16x32xf32, #tpu.memory_space<vmem>>, %arg10: memref<16x32xbf16, #tpu.memory_space<vmem>>, %arg11: memref<16x32xf32, #tpu.memory_space<vmem>>) attributes {dimension_semantics = [#tpu.dimension_semantics<parallel>, #tpu.dimension_semantics<arbitrary>], iteration_bounds = array<i64: 1, 1>, scalar_prefetch = 0 : i64, scratch_operands = 2 : i64, tpu.core_type = #tpu.core_type<tc>, window_params = [{transform_indices = @transform_0, window_bounds = array<i64: 16, 32>}, {pipeline_mode = #tpu.pipeline_mode<synchronous>, transform_indices = @transform_1, window_bounds = array<i64: 1, 32>}, {pipeline_mode = #tpu.pipeline_mode<synchronous>, transform_indices = @transform_2, window_bounds = array<i64: 1, 32>}, {transform_indices = @transform_3, window_bounds = array<i64: 32, 128>}, {transform_indices = @transform_4, window_bounds = array<i64: 1, 128>}, {transform_indices = @transform_5, window_bounds = array<i64: 128, 32>}, {pipeline_mode = #tpu.pipeline_mode<synchronous>, transform_indices = @transform_6, window_bounds = array<i64: 1, 32>}, {transform_indices = @transform_7, window_bounds = array<i64: 16, 32>}]} {
    %c0_i32 = arith.constant 0 : i32
    %0 = arith.cmpi eq, %arg1, %c0_i32 : i32
    %1 = arith.extui %0 : i1 to i32
    %c0_i32_0 = arith.constant 0 : i32
    %2 = arith.cmpi ne, %1, %c0_i32_0 : i32
    scf.if %2 {
      %c0_30 = arith.constant 0 : index
      %c0_31 = arith.constant 0 : index
      %58 = vector.load %arg2[%c0_30, %c0_31] : memref<16x32xf32, #tpu.memory_space<vmem>>, vector<16x32xf32>
      %c0_32 = arith.constant 0 : index
      %c0_33 = arith.constant 0 : index
      %59 = vector.load %arg3[%c0_32, %c0_33] : memref<1x32xf32, #tpu.memory_space<vmem>>, vector<1x32xf32>
      %c0_34 = arith.constant 0 : index
      %c0_35 = arith.constant 0 : index
      %60 = vector.load %arg4[%c0_34, %c0_35] : memref<1x32xf32, #tpu.memory_space<vmem>>, vector<1x32xf32>
      %cst_36 = arith.constant dense<0.000000e+00> : vector<16xf32>
      %61 = vector.multi_reduction <add>, %58, %cst_36 [1] : vector<16x32xf32> to vector<16xf32>
      %62 = vector.shape_cast %61 : vector<16xf32> to vector<16x1xf32>
      %cst_37 = arith.constant 3.200000e+01 : f32
      %63 = vector.broadcast %cst_37 : f32 to vector<16x1xf32>
      %64 = arith.divf %62, %63 : vector<16x1xf32>
      %65 = vector.broadcast %64 : vector<16x1xf32> to vector<16x32xf32>
      %66 = arith.subf %58, %65 : vector<16x32xf32>
      %67 = arith.mulf %66, %66 : vector<16x32xf32>
      %cst_38 = arith.constant dense<0.000000e+00> : vector<16xf32>
      %68 = vector.multi_reduction <add>, %67, %cst_38 [1] : vector<16x32xf32> to vector<16xf32>
      %69 = vector.shape_cast %68 : vector<16xf32> to vector<16x1xf32>
      %cst_39 = arith.constant 3.200000e+01 : f32
      %70 = vector.broadcast %cst_39 : f32 to vector<16x1xf32>
      %71 = arith.divf %69, %70 : vector<16x1xf32>
      %72 = vector.broadcast %64 : vector<16x1xf32> to vector<16x32xf32>
      %73 = arith.subf %58, %72 : vector<16x32xf32>
      %cst_40 = arith.constant 9.99999974E-6 : f32
      %74 = vector.broadcast %cst_40 : f32 to vector<16x1xf32>
      %75 = arith.addf %71, %74 : vector<16x1xf32>
      %76 = math.rsqrt %75 : vector<16x1xf32>
      %77 = vector.broadcast %76 : vector<16x1xf32> to vector<16x32xf32>
      %78 = arith.mulf %73, %77 : vector<16x32xf32>
      %79 = vector.broadcast %59 : vector<1x32xf32> to vector<16x32xf32>
      %80 = arith.mulf %78, %79 : vector<16x32xf32>
      %81 = vector.broadcast %60 : vector<1x32xf32> to vector<16x32xf32>
      %82 = arith.addf %80, %81 : vector<16x32xf32>
      %83 = arith.truncf %82 : vector<16x32xf32> to vector<16x32xbf16>
      %c0_41 = arith.constant 0 : index
      %c0_42 = arith.constant 0 : index
      %84 = vector.load %arg10[%c0_41, %c0_42] : memref<16x32xbf16, #tpu.memory_space<vmem>>, vector<16x32xbf16>
      tpu.vector_store %arg10[%c0_41, %c0_42], %83 {strides = array<i32>} : memref<16x32xbf16, #tpu.memory_space<vmem>>, vector<16x32xbf16>,
      %cst_43 = arith.constant 0.000000e+00 : f32
      %85 = vector.broadcast %cst_43 : f32 to vector<16x32xf32>
      %c0_44 = arith.constant 0 : index
      %c0_45 = arith.constant 0 : index
      %86 = vector.load %arg11[%c0_44, %c0_45] : memref<16x32xf32, #tpu.memory_space<vmem>>, vector<16x32xf32>
      tpu.vector_store %arg11[%c0_44, %c0_45], %85 {strides = array<i32>} : memref<16x32xf32, #tpu.memory_space<vmem>>, vector<16x32xf32>,
    } else {
    }
    %c0 = arith.constant 0 : index
    %c0_1 = arith.constant 0 : index
    %3 = vector.load %arg10[%c0, %c0_1] : memref<16x32xbf16, #tpu.memory_space<vmem>>, vector<16x32xbf16>
    %c0_2 = arith.constant 0 : index
    %c0_3 = arith.constant 0 : index
    %4 = vector.load %arg5[%c0_2, %c0_3] : memref<32x128xbf16, #tpu.memory_space<vmem>>, vector<32x128xbf16>
    %cst = arith.constant dense<0.000000e+00> : vector<16x128xf32>
    %5 = tpu.matmul %3, %4, %cst {dimension_numbers = #tpu.dot_dimension_numbers<[1], [0], [0], [1], [0, 0, 1, 1], [], []>} : vector<16x32xbf16>, vector<32x128xbf16>, vector<16x128xf32> -> vector<16x128xf32>
    %c0_4 = arith.constant 0 : index
    %c0_5 = arith.constant 0 : index
    %6 = vector.load %arg6[%c0_4, %c0_5] : memref<1x128xf32, #tpu.memory_space<vmem>>, vector<1x128xf32>
    %7 = vector.broadcast %6 : vector<1x128xf32> to vector<16x128xf32>
    %8 = arith.addf %5, %7 : vector<16x128xf32>
    %cst_6 = arith.constant 5.000000e-01 : f32
    %9 = vector.broadcast %cst_6 : f32 to vector<16x128xf32>
    %10 = arith.mulf %9, %8 : vector<16x128xf32>
    %cst_7 = arith.constant 0.707106769 : f32
    %11 = vector.broadcast %cst_7 : f32 to vector<16x128xf32>
    %12 = arith.mulf %8, %11 : vector<16x128xf32>
    %13 = math.absf %12 : vector<16x128xf32>
    %cst_8 = arith.constant 0.327591091 : f32
    %14 = vector.broadcast %cst_8 : f32 to vector<16x128xf32>
    %15 = arith.mulf %14, %13 : vector<16x128xf32>
    %cst_9 = arith.constant 1.000000e+00 : f32
    %16 = vector.broadcast %cst_9 : f32 to vector<16x128xf32>
    %17 = arith.addf %16, %15 : vector<16x128xf32>
    %cst_10 = arith.constant 1.000000e+00 : f32
    %18 = vector.broadcast %cst_10 : f32 to vector<16x128xf32>
    %19 = arith.divf %18, %17 : vector<16x128xf32>
    %cst_11 = arith.constant 1.06140542 : f32
    %20 = vector.broadcast %cst_11 : f32 to vector<16x128xf32>
    %21 = arith.mulf %19, %20 : vector<16x128xf32>
    %cst_12 = arith.constant -1.45315206 : f32
    %22 = vector.broadcast %cst_12 : f32 to vector<16x128xf32>
    %23 = arith.addf %22, %21 : vector<16x128xf32>
    %24 = arith.mulf %19, %23 : vector<16x128xf32>
    %cst_13 = arith.constant 1.42141378 : f32
    %25 = vector.broadcast %cst_13 : f32 to vector<16x128xf32>
    %26 = arith.addf %25, %24 : vector<16x128xf32>
    %27 = arith.mulf %19, %26 : vector<16x128xf32>
    %cst_14 = arith.constant -0.284496725 : f32
    %28 = vector.broadcast %cst_14 : f32 to vector<16x128xf32>
    %29 = arith.addf %28, %27 : vector<16x128xf32>
    %30 = arith.mulf %19, %29 : vector<16x128xf32>
    %cst_15 = arith.constant 0.254829586 : f32
    %31 = vector.broadcast %cst_15 : f32 to vector<16x128xf32>
    %32 = arith.addf %31, %30 : vector<16x128xf32>
    %33 = arith.mulf %19, %32 : vector<16x128xf32>
    %cst_16 = arith.constant 0.000000e+00 : f32
    %34 = vector.broadcast %cst_16 : f32 to vector<16x128xf32>
    %35 = arith.subf %34, %13 : vector<16x128xf32>
    %36 = arith.mulf %35, %13 : vector<16x128xf32>
    %37 = math.exp %36 : vector<16x128xf32>
    %38 = arith.mulf %33, %37 : vector<16x128xf32>
    %cst_17 = arith.constant 1.000000e+00 : f32
    %39 = vector.broadcast %cst_17 : f32 to vector<16x128xf32>
    %40 = arith.subf %39, %38 : vector<16x128xf32>
    %cst_18 = arith.constant 0.000000e+00 : f32
    %41 = vector.broadcast %cst_18 : f32 to vector<16x128xf32>
    %42 = arith.cmpf olt, %12, %41 : vector<16x128xf32>
    %cst_19 = arith.constant 0.000000e+00 : f32
    %43 = vector.broadcast %cst_19 : f32 to vector<16x128xf32>
    %44 = arith.subf %43, %40 : vector<16x128xf32>
    %45 = arith.select %42, %44, %40 : vector<16x128xi1>, vector<16x128xf32>
    %cst_20 = arith.constant 1.000000e+00 : f32
    %46 = vector.broadcast %cst_20 : f32 to vector<16x128xf32>
    %47 = arith.addf %46, %45 : vector<16x128xf32>
    %48 = arith.mulf %10, %47 : vector<16x128xf32>
    %c0_21 = arith.constant 0 : index
    %c0_22 = arith.constant 0 : index
    %49 = vector.load %arg11[%c0_21, %c0_22] : memref<16x32xf32, #tpu.memory_space<vmem>>, vector<16x32xf32>
    %50 = arith.truncf %48 : vector<16x128xf32> to vector<16x128xbf16>
    %c0_23 = arith.constant 0 : index
    %c0_24 = arith.constant 0 : index
    %51 = vector.load %arg7[%c0_23, %c0_24] : memref<128x32xbf16, #tpu.memory_space<vmem>>, vector<128x32xbf16>
    %cst_25 = arith.constant dense<0.000000e+00> : vector<16x32xf32>
    %52 = tpu.matmul %50, %51, %cst_25 {dimension_numbers = #tpu.dot_dimension_numbers<[1], [0], [0], [1], [0, 0, 1, 1], [], []>} : vector<16x128xbf16>, vector<128x32xbf16>, vector<16x32xf32> -> vector<16x32xf32>
    %53 = arith.addf %49, %52 : vector<16x32xf32>
    %c0_26 = arith.constant 0 : index
    %c0_27 = arith.constant 0 : index
    %54 = vector.load %arg11[%c0_26, %c0_27] : memref<16x32xf32, #tpu.memory_space<vmem>>, vector<16x32xf32>
    tpu.vector_store %arg11[%c0_26, %c0_27], %53 {strides = array<i32>} : memref<16x32xf32, #tpu.memory_space<vmem>>, vector<16x32xf32>,
    %c0_i32_28 = arith.constant 0 : i32
    %55 = arith.cmpi eq, %arg1, %c0_i32_28 : i32
    %56 = arith.extui %55 : i1 to i32
    %c0_i32_29 = arith.constant 0 : i32
    %57 = arith.cmpi ne, %56, %c0_i32_29 : i32
    scf.if %57 {
      %c0_30 = arith.constant 0 : index
      %c0_31 = arith.constant 0 : index
      %58 = vector.load %arg11[%c0_30, %c0_31] : memref<16x32xf32, #tpu.memory_space<vmem>>, vector<16x32xf32>
      %c0_32 = arith.constant 0 : index
      %c0_33 = arith.constant 0 : index
      %59 = vector.load %arg8[%c0_32, %c0_33] : memref<1x32xf32, #tpu.memory_space<vmem>>, vector<1x32xf32>
      %60 = vector.broadcast %59 : vector<1x32xf32> to vector<16x32xf32>
      %61 = arith.addf %58, %60 : vector<16x32xf32>
      %c0_34 = arith.constant 0 : index
      %c0_35 = arith.constant 0 : index
      %62 = vector.load %arg9[%c0_34, %c0_35] : memref<16x32xf32, #tpu.memory_space<vmem>>, vector<16x32xf32>
      tpu.vector_store %arg9[%c0_34, %c0_35], %61 {strides = array<i32>} : memref<16x32xf32, #tpu.memory_space<vmem>>, vector<16x32xf32>,
    } else {
    }
    return
  }
  func.func @transform_0(%arg0: i32, %arg1: i32) -> (i32, i32) {
    %c0_i32 = arith.constant 0 : i32
    %c0_i32_0 = arith.constant 0 : i32
    return %arg0, %c0_i32 : i32, i32
  }
  func.func @transform_1(%arg0: i32, %arg1: i32) -> (i32, i32) {
    %c0_i32 = arith.constant 0 : i32
    %c0_i32_0 = arith.constant 0 : i32
    %c0_i32_1 = arith.constant 0 : i32
    return %c0_i32, %c0_i32_0 : i32, i32
  }
  func.func @transform_2(%arg0: i32, %arg1: i32) -> (i32, i32) {
    %c0_i32 = arith.constant 0 : i32
    %c0_i32_0 = arith.constant 0 : i32
    %c0_i32_1 = arith.constant 0 : i32
    return %c0_i32, %c0_i32_0 : i32, i32
  }
  func.func @transform_3(%arg0: i32, %arg1: i32) -> (i32, i32) {
    %c0_i32 = arith.constant 0 : i32
    %c0_i32_0 = arith.constant 0 : i32
    return %c0_i32, %arg1 : i32, i32
  }
  func.func @transform_4(%arg0: i32, %arg1: i32) -> (i32, i32) {
    %c0_i32 = arith.constant 0 : i32
    %c0_i32_0 = arith.constant 0 : i32
    return %c0_i32, %arg1 : i32, i32
  }
  func.func @transform_5(%arg0: i32, %arg1: i32) -> (i32, i32) {
    %c0_i32 = arith.constant 0 : i32
    %c0_i32_0 = arith.constant 0 : i32
    return %arg1, %c0_i32 : i32, i32
  }
  func.func @transform_6(%arg0: i32, %arg1: i32) -> (i32, i32) {
    %c0_i32 = arith.constant 0 : i32
    %c0_i32_0 = arith.constant 0 : i32
    %c0_i32_1 = arith.constant 0 : i32
    return %c0_i32, %c0_i32_0 : i32, i32
  }
  func.func @transform_7(%arg0: i32, %arg1: i32) -> (i32, i32) {
    %c0_i32 = arith.constant 0 : i32
    %c0_i32_0 = arith.constant 0 : i32
    return %arg0, %c0_i32 : i32, i32
  }
}

</mosaic_0001>

<bundles_post_ra>
// kernel: enc_dec_block.3
= control target key start
LH: loop header
LB: loop body
LE: loop exit
PB: predicated region body
PF: predicated region fallthrough
CT: control target
= control target key end

     0   :  { %vm36_vm0 = vcmask 261120   ;;  %s583_s0 = inlined_call_operand.vmem [shape: f32[16,32], index: 0, kind: input, shape index: {}]   ;;  %s584_s1 = inlined_call_operand.vmem [shape: f32[1,32], index: 1, kind: input, shape index: {}]   ;;  %s585_s2 = inlined_call_operand.vmem [shape: f32[1,32], index: 2, kind: input, shape index: {}]   ;;  %s586_s3 = inlined_call_operand.vmem [shape: bf16[32,128], index: 3, kind: input, shape index: {}]   ;;  %s587_s4 = inlined_call_operand.vmem [shape: f32[1,128], index: 4, kind: input, shape index: {}]   ;;  %s588_s5 = inlined_call_operand.vmem [shape: bf16[128,32], index: 5, kind: input, shape index: {}]   ;;  %s589_s6 = inlined_call_operand.vmem [shape: f32[1,32], index: 6, kind: input, shape index: {}]   ;;  %s590_s7 = inlined_call_operand.hbm [shape: f32[16,32], index: 7, kind: output, shape index: {}]  }
   0x1   :  { %v32_v0 = vld [vmem:[%s583_s0] sm:$0xff]  ;;  %v33_v1 = vld [vmem:[%s583_s0 + $0x8] sm:$0xff] }
   0x2   :  { %v37_v2 = vsel %vm36_vm0, %v32_v0, 0.0  ;;  %v40_v3 = vsel %vm36_vm0, %v33_v1, 0.0 }
   0x3   :  { %38 = vadd.xlane.f32.xlu0 %v37_v2 }
   0x7   :  { %41 = vadd.xlane.f32.xlu0 %v40_v3 }
   0x8   :  { %12 = vsyncpa [#allocation5], 0  ;;  %v431_v14 = vld [vmem:[%s586_s3 + $0x8] sm:$0xff]   ;;  %v476_v15 = vmov 0.0   ;;  %vm477_vm1 = vmmov 0   ;;  %v432_v16 = vld [vmem:[%s586_s3] sm:$0xff]  }
   0x9   :  { %398 = vmatprep.subr.bf16.mxu0 %v476_v15  ;;  %91 = vst.msk [vmem:[#allocation3] sm:$0xff] %vm36_vm0, %v476_v15  ;;  %92 = vst.msk [vmem:[#allocation3 + $0x8] sm:$0xff] %vm36_vm0, %v476_v15  ;;  %402 = vmatprep.mubr.msk.bf16.mxu0 %vm477_vm1, %v476_v15  ;;  %v366_v24 = vld [vmem:[%s584_s1] ss:$0 sm:$0xff]  ;;  %vm88_vm2 = vcmask 257024   ;;  %v434_v36 = vld [vmem:[%s588_s5 + $0x38] sm:$0xff]  }
   0xa   :  { %399 = vmatpush3.bf16.msra.mxu0 %v431_v14  ;;  %406 = vmatprep.subr.bf16.mxu1 %v476_v15  ;;  %v367_v26 = vld [vmem:[%s585_s2] ss:$0 sm:$0xff]  ;;  %v435_v37 = vld [vmem:[%s588_s5 + $0x30] sm:$0xff]   ;;  %v436_v38 = vld [vmem:[%s588_s5 + $0x28] sm:$0xff]   ;;  %s478_s27 = smov [#allocation4]  }
   0xb   :  { %400 = vmatprep.subr.bf16.mxu0 %v476_v15  ;;  %422 = vmatprep.mubr.msk.bf16.mxu1 %vm477_vm1, %v476_v15  ;;  %v437_v39 = vld [vmem:[%s588_s5 + $0x20] sm:$0xff]   ;;  %v438_v40 = vld [vmem:[%s588_s5 + $0x18] sm:$0xff]   ;;  %v439_v41 = vld [vmem:[%s588_s5 + $0x10] sm:$0xff]   ;;  %s355_s0 = sshll.u32 %s478_s27, 4  ;;  %s356_s0 = int_to_ptr.vmem [resolvable:$true] %s355_s0 }
   0xc   :  { %407 = vmatpush3.bf16.msra.mxu1 %v434_v36  ;;  %v440_v42 = vld [vmem:[%s588_s5 + $0x8] sm:$0xff]   ;;  %v441_v43 = vld [vmem:[%s588_s5] sm:$0xff]   ;;  %s454_s28 = scalar_lea.vmem %s356_s0, 256  ;;  %p459_p1 = scmp.lt.s32.totalorder %s356_s0, %s356_s0 }
   0xd   :  { %408 = vmatprep.subr.bf16.mxu1 %v476_v15  ;;  %v370_v44 = vld [vmem:[%s587_s4] ss:$0 sm:$0xff]  ;;  %p455_p0 = scmp.ne.s32.totalorder %s356_s0, %s454_s28  ;;  %p460_p2 = scmp.lt.s32.totalorder %s454_s28, %s454_s28 }
   0xe   :  { %401 = vmatpush3.bf16.msra.mxu0 %v432_v16 }
   0xf   :  { %p461_p3 = por %p460_p2, %p459_p1 }
  0x10   :  { %409 = vmatpush3.bf16.msra.mxu1 %v435_v37 }
  0x11   :  { %410 = vmatprep.subr.bf16.mxu1 %v476_v15  ;;  %p462_p4 = pnand %p461_p3, %p455_p0 }
  0x14   :  { %411 = vmatpush3.bf16.msra.mxu1 %v436_v38  ;;  %v222_v38 = vld [vmem:[#allocation3] sm:$0xff] }
  0x15   :  { %412 = vmatprep.subr.bf16.mxu1 %v476_v15 }
  0x18   :  { %413 = vmatpush3.bf16.msra.mxu1 %v437_v39 }
  0x19   :  { %414 = vmatprep.subr.bf16.mxu1 %v476_v15 }
  0x1c   :  { %415 = vmatpush3.bf16.msra.mxu1 %v438_v40 }
  0x1d   :  { %416 = vmatprep.subr.bf16.mxu1 %v476_v15 }
  0x20   :  { %417 = vmatpush3.bf16.msra.mxu1 %v439_v41 }
  0x21   :  { %418 = vmatprep.subr.bf16.mxu1 %v476_v15 }
  0x24   :  { %419 = vmatpush3.bf16.msra.mxu1 %v440_v42  ;;  %v223_v42 = vld [vmem:[#allocation3 + $0x8] sm:$0xff] }
  0x25   :  { %420 = vmatprep.subr.bf16.mxu1 %v476_v15 }
  0x28   :  { %421 = vmatpush3.bf16.msra.mxu1 %v441_v43 }
  0x8c   :  { %v39_v4 = vpop.xlane.xlu0 %38 }
  0x8d   :  { %v44_v5 = vmul.f32 0.03125, %v39_v4 }
  0x8f   :  { %v46_v6 = vsub.f32 %v32_v0, %v44_v5 }
  0x90   :  { %v42_v7 = vpop.xlane.xlu0 %41 }
  0x91   :  { %v45_v8 = vmul.f32 0.03125, %v42_v7  ;;  %v48_v9 = vmul.f32 %v46_v6, %v46_v6 }
  0x93   :  { %v47_v10 = vsub.f32 %v33_v1, %v45_v8  ;;  %v50_v11 = vsel %vm36_vm0, %v48_v9, 0.0 }
  0x94   :  { %51 = vadd.xlane.f32.xlu1 %v50_v11 }
  0x95   :  { %v49_v12 = vmul.f32 %v47_v10, %v47_v10 }
  0x97   :  { %v53_v13 = vsel %vm36_vm0, %v49_v12, 0.0 }
  0x98   :  { %54 = vadd.xlane.f32.xlu1 %v53_v13 }
 0x11d   :  { %v52_v17 = vpop.xlane.xlu1 %51 }
 0x11e   :  { %v56_v18 = vmul.f32 0.03125, %v52_v17 }
 0x120   :  { %v58_v19 = vadd.f32 1e-05, %v56_v18 }
 0x121   :  { %v55_v20 = vpop.xlane.xlu1 %54 }
 0x122   :  { %442 = vrsqrt.f32 %v58_v19  ;;  %v57_v21 = vmul.f32 0.03125, %v55_v20 }
 0x124   :  { %v59_v22 = vadd.f32 1e-05, %v57_v21 }
 0x126   :  { %444 = vrsqrt.f32 %v59_v22 }
 0x12f   :  { %v443_v23 = vpop.eup %442 }
 0x130   :  { %v62_v25 = vmul.f32 %v443_v23, %v46_v6 }
 0x132   :  { %v70_v27 = vmul.f32 %v366_v24, %v62_v25 }
 0x133   :  { %v445_v28 = vpop.eup %444 }
 0x134   :  { %v78_v29 = vadd.f32 %v367_v26, %v70_v27  ;;  %v63_v30 = vmul.f32 %v445_v28, %v47_v10 }
 0x136   :  { %v384_v31 = vpack.c.bf16 %v78_v29, %v78_v29  ;;  %v71_v32 = vmul.f32 %v366_v24, %v63_v30 }
 0x138   :  { %89 = vst.msk [vmem:[#allocation2] sm:$0xf] %vm88_vm2, %v384_v31  ;;  %v79_v33 = vadd.f32 %v367_v26, %v71_v32 }
 0x13a   :  { %v385_v34 = vpack.c.bf16 %v79_v33, %v79_v33 }
 0x13c   :  { %90 = vst.msk [vmem:[#allocation2 + $0x4] sm:$0xf] %vm88_vm2, %v385_v34 }
 0x143   :  { %v433_v35 = vld [vmem:[#allocation2] sm:$0xff]  }
 0x144   :  { %403 = vmatmul.mubr.msk.bf16.vlgmr.msra.gmra.mxu0 %vm36_vm0, %v433_v35 }
 0x204   :  { %v161_v45 = vpop.f32.mrf.mxu0 }
 0x205   :  { %v162_v46 = vadd.f32 %v370_v44, %v161_v45 }
 0x206   :  { %v404_v47 = vpop.f32.mrf.mxu0 }
 0x207   :  { %v170_v48 = vmul.f32 0.70710677, %v162_v46  ;;  %v168_v32 = vmul.f32 0.5, %v162_v46  ;;  %v383_v46 = vld [vmem:[%s589_s6] ss:$0 sm:$0xff] }
 0x208   :  { %v164_v49 = vpop.f32.mrf.mxu0 }
 0x209   :  { %v172_v50 = vand.u32 2147483647, %v170_v48  ;;  %v165_v51 = vadd.f32 %v370_v44, %v164_v49  ;;  %vm212_vm3 = vcmp.lt.f32.partialorder %v170_v48, 0.0 }
 0x20a   :  { %v405_v52 = vpop.f32.mrf.mxu0 }
 0x20b   :  { %v174_v53 = vmul.f32 0.3275911, %v172_v50  ;;  %v171_v54 = vmul.f32 0.70710677, %v165_v51  ;;  %v200_v59 = vsub.f32 0.0, %v172_v50  ;;  %v169_v33 = vmul.f32 0.5, %v165_v51 }
 0x20d   :  { %v176_v55 = vadd.f32 1.0, %v174_v53  ;;  %v173_v56 = vand.u32 2147483647, %v171_v54  ;;  %v202_v60 = vmul.f32 %v200_v59, %v172_v50  ;;  %vm213_vm4 = vcmp.lt.f32.partialorder %v171_v54, 0.0 }
 0x20f   :  { %446 = vrcp.f32 %v176_v55  ;;  %v175_v57 = vmul.f32 0.3275911, %v173_v56  ;;  %v201_v61 = vsub.f32 0.0, %v173_v56  ;;  %v204_v0 = vmul.f32 1.442695, %v202_v60 }
 0x211   :  { %v177_v58 = vadd.f32 1.0, %v175_v57  ;;  %v203_v1 = vmul.f32 %v201_v61, %v173_v56 }
 0x213   :  { %448 = vrcp.f32 %v177_v58  ;;  %v206_v6 = vmul.f32 1.442695, %v203_v1 }
 0x214   :  { %450 = vpow2.f32 %v204_v0 }
 0x215   :  { %452 = vpow2.f32 %v206_v6 }
 0x21c   :  { %v447_v62 = vpop.eup %446 }
 0x21d   :  { %v182_v63 = vmul.f32 1.0614054, %v447_v62 }
 0x21f   :  { %v184_v2 = vadd.f32 -1.4531521, %v182_v63 }
 0x220   :  { %v449_v3 = vpop.eup %448 }
 0x221   :  { %v186_v4 = vmul.f32 %v447_v62, %v184_v2  ;;  %v183_v5 = vmul.f32 1.0614054, %v449_v3  ;;  %v451_v19 = vpop.eup %450 }
 0x222   :  { %v453_v24 = vpop.eup %452 }
 0x223   :  { %v188_v7 = vadd.f32 1.4214138, %v186_v4  ;;  %v185_v8 = vadd.f32 -1.4531521, %v183_v5 }
 0x225   :  { %v190_v9 = vmul.f32 %v447_v62, %v188_v7  ;;  %v187_v10 = vmul.f32 %v449_v3, %v185_v8 }
 0x227   :  { %v192_v11 = vadd.f32 -0.28449672, %v190_v9  ;;  %v189_v12 = vadd.f32 1.4214138, %v187_v10 }
 0x229   :  { %v194_v13 = vmul.f32 %v447_v62, %v192_v11  ;;  %v191_v14 = vmul.f32 %v449_v3, %v189_v12 }
 0x22b   :  { %v196_v15 = vadd.f32 0.2548296, %v194_v13  ;;  %v193_v16 = vadd.f32 -0.28449672, %v191_v14 }
 0x22d   :  { %v198_v17 = vmul.f32 %v447_v62, %v196_v15  ;;  %v195_v18 = vmul.f32 %v449_v3, %v193_v16 }
 0x22f   :  { %v208_v20 = vmul.f32 %v451_v19, %v198_v17  ;;  %v197_v21 = vadd.f32 0.2548296, %v195_v18 }
 0x231   :  { %v210_v22 = vsub.f32 1.0, %v208_v20  ;;  %v199_v23 = vmul.f32 %v449_v3, %v197_v21 }
 0x233   :  { %v214_v25 = vsub.f32 0.0, %v210_v22  ;;  %v209_v26 = vmul.f32 %v453_v24, %v199_v23 }
 0x235   :  { %v216_v27 = vsel %vm212_vm3, %v214_v25, %v210_v22  ;;  %v211_v28 = vsub.f32 1.0, %v209_v26 }
 0x236   :  { %v218_v30 = vadd.f32 1.0, %v216_v27 }
 0x237   :  { %v215_v29 = vsub.f32 0.0, %v211_v28 }
 0x238   :  { %v220_v35 = vmul.f32 %v218_v30, %v168_v32 }
 0x239   :  { %v217_v31 = vsel %vm213_vm4, %v215_v29, %v211_v28 }
 0x23a   :  { %v219_v34 = vadd.f32 1.0, %v217_v31 }
 0x23c   :  { %v221_v36 = vmul.f32 %v219_v34, %v169_v33 }
 0x23e   :  { %v224_v37 = vpack.c.bf16 %v221_v36, %v220_v35 }
 0x240   :  { %423 = vmatmul.mubr.bf16.vlgmr.msra.gmra.mxu1 %v224_v37 }
 0x300   :  { %v323_v39 = vpop.f32.mrf.mxu1 }
 0x301   :  { %v330_v40 = vadd.f32 %v323_v39, %v222_v38 }
 0x302   :  { %v424_v41 = vpop.f32.mrf.mxu1 }
 0x303   :  { %332 = vst.msk [vmem:[#allocation3] sm:$0xff] %vm36_vm0, %v330_v40 }
 0x304   :  { %v326_v43 = vpop.f32.mrf.mxu1 }
 0x305   :  { %v331_v44 = vadd.f32 %v326_v43, %v223_v42 }
 0x306   :  { %v425_v45 = vpop.f32.mrf.mxu1 }
 0x307   :  { %333 = vst.msk [vmem:[#allocation3 + $0x8] sm:$0xff] %vm36_vm0, %v331_v44 }
 0x30a   :  { %v337_v47 = vld [vmem:[#allocation3] sm:$0xff] }
 0x30b   :  { %v346_v48 = vadd.f32 %v383_v46, %v337_v47 }
 0x30d   :  { %348 = vst.msk [vmem:[#allocation4] sm:$0xff] %vm36_vm0, %v346_v48 }
 0x30e   :  { %v338_v49 = vld [vmem:[#allocation3 + $0x8] sm:$0xff] }
 0x30f   :  { %v347_v50 = vadd.f32 %v383_v46, %v338_v49 }
 0x311   :  { %349 = vst.msk [vmem:[#allocation4 + $0x8] sm:$0xff] %vm36_vm0, %v347_v50 }
 0x312   :  { %465 = shalt.err (!%p462_p4)
}
 0x313   :  { %s479_s29 = smov 128   ;;  %s480_s6 = smov 8  }
 0x314   :  { %361 = dma.vmem_to_hbm [thread:$0]  %s356_s0, 256, %s590_s7, [#allocation5], %s479_s29, %s479_s29, %s480_s6  }
 0x315   :  { %474 = dma.done.wait [#allocation5], 256  }
 0x316   :  { %475 = vsyncadd [#allocation5], 4294967040 }
 0x317   :  { %365 = vsyncpa [#allocation5], 1 }

// kernel: enc_dec_block.2
= control target key start
LH: loop header
LB: loop body
LE: loop exit
PB: predicated region body
PF: predicated region fallthrough
CT: control target
= control target key end

     0   :  { %s2255_s30 = smov 0   ;;  %s2257_s10 = smov 0   ;;  %s2573_s0 = inlined_call_operand.vmem [shape: f32[2,8,32], index: 0, kind: input, shape index: {}]   ;;  %s2574_s1 = inlined_call_operand.vmem [shape: f32[2,8,16], index: 1, kind: input, shape index: {}]   ;;  %s2575_s2 = inlined_call_operand.vmem [shape: f32[1,32], index: 2, kind: input, shape index: {}]   ;;  %s2576_s3 = inlined_call_operand.vmem [shape: f32[1,32], index: 3, kind: input, shape index: {}]   ;;  %s2577_s4 = inlined_call_operand.vmem [shape: bf16[4,32,8], index: 4, kind: input, shape index: {}]   ;;  %s2578_s5 = inlined_call_operand.vmem [shape: bf16[4,16,8], index: 5, kind: input, shape index: {}]   ;;  %s2579_s6 = inlined_call_operand.vmem [shape: bf16[4,16,8], index: 6, kind: input, shape index: {}]   ;;  %s2580_s7 = inlined_call_operand.vmem [shape: bf16[32,32], index: 7, kind: input, shape index: {}]   ;;  %s2581_s8 = inlined_call_operand.vmem [shape: f32[1,32], index: 8, kind: input, shape index: {}]   ;;  %s2582_s9 = inlined_call_operand.vmem [shape: f32[2,8,32], index: 9, kind: output, shape index: {}]  }
   0x1   :  { %s2259_s11 = smov 0  }
   0x2 LB: > { %s38_s12 = sadd.s32 1, %s2192_s10  ;;  %p1842_p0 = scmp.ge.s32.totalorder %s2196_s11, 1  ;;  %s2196_s11 = sphi %s2259_s11, %s19_s11   ;;  %s2192_s10 = sphi %s2257_s10, %s2584_s10   ;;  %s2188_s30 = sphi %s2255_s30, %s2583_s30  }
   0x3   : > { %p40_p1 = scmp.ge.s32.totalorder %s38_s12, 2  ;;  %p326_p2 = scmp.lt.s32.totalorder %s2196_s11, 3 }
   0x5   : > { %s2586_s12 = smov (%p40_p1, %s38_s12), 0  ;;  %p327_p3 = pnand %p1842_p0, %p326_p2 }
   0x6   : > { %p373_p4 = scmp.lt.s32.totalorder (!%p327_p3), %s2188_s30, 1  ;;  %s2202_s22 = smov (!%p327_p3), 8  }
   0x7   : > { %330 = sbr.rel (%p327_p3) target bundleno = 2267 (0x8db), region = 56  ;;  %s2203_s23 = smov (!%p327_p3), 16  }
   0x8   : > { %s2204_s28 = smov (!%p327_p3), 24  }
   0xc   : > { %s2588_s30 = smov (!%p373_p4, %s2188_s30), 1  ;;  %vm402_vm0 = vcmask 261120   ;;  %v2130_v7 = vld [vmem:[%s2577_s4 + $0x8] sm:$0xff]   ;;  %v2131_v8 = vld [vmem:[%s2577_s4 + $0x18] sm:$0xff]   ;;  %v2198_v9 = vmov 0.0   ;;  %v2132_v10 = vld [vmem:[%s2577_s4] sm:$0xff]  }
   0xd   : > { %s2273_s13 = sshll.u32 %s2588_s30, 3  ;;  %1961 = vmatprep.subr.bf16.mxu0 %v2198_v9  ;;  %1969 = vmatprep.subr.bf16.mxu1 %v2198_v9  ;;  %v2133_v11 = vld [vmem:[%s2577_s4 + $0x10] sm:$0xff]   ;;  %vm2199_vm1 = vmmov 0   ;;  %v1846_v16 = vld [vmem:[%s2575_s2] ss:$0 sm:$0xff]  ;;  %v2134_v21 = vld [vmem:[%s2577_s4 + $0x28] sm:$0xff]  }
   0xe   : > { %s379_s16 = scalar_lea.vmem %s2573_s0, %s2273_s13  ;;  %1962 = vmatpush3.bf16.msra.mxu0 %v2130_v7  ;;  %1970 = vmatpush3.bf16.msra.mxu1 %v2131_v8  ;;  %v1847_v18 = vld [vmem:[%s2576_s3] ss:$0 sm:$0xff]  ;;  %v2135_v22 = vld [vmem:[%s2577_s4 + $0x38] sm:$0xff]   ;;  %v2137_v25 = vld [vmem:[%s2577_s4 + $0x30] sm:$0xff]   ;;  %s386_s24 = scalar_lea.vmem %s2574_s1, %s2273_s13  ;;  %vm698_vm2 = vcmask 130048   ;;  %vm683_vm3 = vcmask 64512  }
   0xf   : > { %v2279_v0 = vld [vmem:[%s379_s16] sm:$0xff]  ;;  %1963 = vmatprep.subr.bf16.mxu0 %v2198_v9  ;;  %1971 = vmatprep.subr.bf16.mxu1 %v2198_v9  ;;  %684 = vst.msk [vmem:[#allocation5] sm:$0xff] %vm683_vm3, %v2198_v9  ;;  %685 = vst.msk [vmem:[#allocation5 + $0x8] sm:$0xff] %vm683_vm3, %v2198_v9  ;;  %vm492_vm4 = vcmask 60416   ;;  %v2139_v55 = vld [vmem:[%s2578_s5 + $0x8] sm:$0xff]   ;;  %vm674_vm5 = vcmask 7168   ;;  %s393_s16 = scalar_lea.vmem %s2582_s9, %s2273_s13 }
  0x10   : > { %v403_v1 = vsel %vm402_vm0, %v2279_v0, 0.0  ;;  %1965 = vmatprep.mubr.msk.bf16.mxu0 %vm2199_vm1, %v2198_v9  ;;  %1973 = vmatprep.mubr.msk.bf16.mxu1 %vm2199_vm1, %v2198_v9  ;;  %v2136_v24 = vld [vmem:[%s2577_s4 + $0x20] sm:$0xff]   ;;  %686 = vst.msk [vmem:[#allocation5 + $0x10] sm:$0xff] %vm683_vm3, %v2198_v9  ;;  %687 = vst.msk [vmem:[#allocation5 + $0x18] sm:$0xff] %vm683_vm3, %v2198_v9  ;;  %v2200_v58 = vmov -inf   ;;  %v2140_v8 = vld [vmem:[%s2578_s5 + $0x10] sm:$0xff]  }
  0x11   : > { %404 = vadd.xlane.f32.xlu0 %v403_v1  ;;  %v2138_v26 = vld [vmem:[%s2578_s5] sm:$0xff]   ;;  %675 = vst.msk [vmem:[#allocation3] sm:$0xff] %vm674_vm5, %v2200_v58  ;;  %676 = vst.msk [vmem:[#allocation3 + $0x8] sm:$0xff] %vm674_vm5, %v2200_v58  ;;  %vm875_vm6 = vcmask 1043456   ;;  %vm1641_vm7 = vcmask 130112   ;;  %vm1656_vm8 = vcmask 195712  }
  0x12   : > { %1964 = vmatpush3.bf16.msra.mxu0 %v2132_v10  ;;  %1972 = vmatpush3.bf16.msra.mxu1 %v2133_v11  ;;  %v688_v27 = vld [vmem:[%s386_s24] sm:$0xff]  ;;  %677 = vst.msk [vmem:[#allocation3 + $0x10] sm:$0xff] %vm674_vm5, %v2200_v58  ;;  %678 = vst.msk [vmem:[#allocation3 + $0x18] sm:$0xff] %vm674_vm5, %v2200_v58  ;;  %vm1671_vm9 = vcmask 261312  }
  0x13   : > { %1977 = vmatprep.subr.bf16.mxu0 %v2198_v9  ;;  %1985 = vmatprep.subr.bf16.mxu1 %v2198_v9  ;;  %v2349_v28 = vpack.c.bf16 %v688_v27, %v688_v27  ;;  %v2141_v57 = vld [vmem:[%s2579_s6] sm:$0xff]   ;;  %679 = vst.msk [vmem:[#allocation4] sm:$0xff] %vm674_vm5, %v2198_v9  ;;  %680 = vst.msk [vmem:[#allocation4 + $0x8] sm:$0xff] %vm674_vm5, %v2198_v9 }
  0x14   : > { %681 = vst.msk [vmem:[#allocation4 + $0x10] sm:$0xff] %vm674_vm5, %v2198_v9  ;;  %682 = vst.msk [vmem:[#allocation4 + $0x18] sm:$0xff] %vm674_vm5, %v2198_v9 }
  0x18   : > { %v2417_v11 = vld [vmem:[#allocation3] sm:$0xff] }
  0x9a   : > { %v405_v2 = vpop.xlane.xlu0 %404 }
  0x9b   : > { %v407_v3 = vmul.f32 0.03125, %v405_v2 }
  0x9d   : > { %v408_v4 = vsub.f32 %v2279_v0, %v407_v3 }
  0x9f   : > { %v409_v5 = vmul.f32 %v408_v4, %v408_v4 }
  0xa1   : > { %v410_v6 = vsel %vm402_vm0, %v409_v5, 0.0 }
  0xa2   : > { %411 = vadd.xlane.f32.xlu0 %v410_v6  ;;  %v2201_v6 = vmov 0  }
  0xa3   : > { %2128 = vset.pattern.permute.xlu1 %v2201_v6  ;;  %2129 = vset.pattern.permute.xlu0 %v2201_v6 }
 0x12b   : > { %v412_v12 = vpop.xlane.xlu0 %411 }
 0x12c   : > { %v413_v13 = vmul.f32 0.03125, %v412_v12 }
 0x12e   : > { %v414_v14 = vadd.f32 1e-05, %v413_v13 }
 0x130   : > { %2148 = vrsqrt.f32 %v414_v14 }
 0x13d   : > { %v2149_v15 = vpop.eup %2148 }
 0x13e   : > { %v416_v17 = vmul.f32 %v2149_v15, %v408_v4 }
 0x140   : > { %v423_v19 = vmul.f32 %v1846_v16, %v416_v17 }
 0x142   : > { %v430_v20 = vadd.f32 %v1847_v18, %v423_v19 }
 0x144   : > { %v431_v23 = vpack.c.bf16 %v430_v20, %v430_v20 }
 0x146   : > { %1966 = vmatmul.mubr.msk.bf16.vlgmr.msra.gmra.mxu0 %vm402_vm0, %v431_v23  ;;  %1974 = vmatmul.mubr.msk.bf16.vlgmr.msra.gmra.mxu1 %vm402_vm0, %v431_v23 }
 0x147   : > { %1978 = vmatpush3.bf16.msra.mxu0 %v2134_v21  ;;  %1986 = vmatpush3.bf16.msra.mxu1 %v2135_v22 }
 0x148   : > { %1979 = vmatprep.subr.bf16.mxu0 %v2198_v9  ;;  %1987 = vmatprep.subr.bf16.mxu1 %v2198_v9 }
 0x149   : > { %1981 = vmatprep.mubr.msk.bf16.mxu0 %vm2199_vm1, %v2198_v9  ;;  %1989 = vmatprep.mubr.msk.bf16.mxu1 %vm2199_vm1, %v2198_v9 }
 0x14b   : > { %1980 = vmatpush3.bf16.msra.mxu0 %v2136_v24  ;;  %1988 = vmatpush3.bf16.msra.mxu1 %v2137_v25 }
 0x14c   : > { %1993 = vmatprep.subr.bf16.mxu0 %v2198_v9  ;;  %1999 = vmatprep.subr.bf16.mxu1 %v2198_v9 }
 0x14e   : > { %1982 = vmatmul.mubr.msk.bf16.vlgmr.msra.gmra.mxu0 %vm402_vm0, %v431_v23  ;;  %1990 = vmatmul.mubr.msk.bf16.vlgmr.msra.gmra.mxu1 %vm402_vm0, %v431_v23 }
 0x14f   : > { %1994 = vmatpush3.bf16.msra.mxu0 %v2138_v26  ;;  %1995 = vmatprep.mubr.msk.bf16.mxu0 %vm2199_vm1, %v2198_v9 }
 0x150   : > { %2005 = vmatprep.subr.bf16.mxu0 %v2198_v9  ;;  %2001 = vmatprep.mubr.msk.bf16.mxu1 %vm2199_vm1, %v2198_v9 }
 0x151   : > { %2000 = vmatpush3.bf16.msra.mxu1 %v2141_v57 }
 0x152   : > { %2011 = vmatprep.subr.bf16.mxu1 %v2198_v9 }
 0x156   : > { %1996 = vmatmul.mubr.msk.bf16.vlgmr.msra.gmra.mxu0 %vm698_vm2, %v2349_v28  ;;  %2002 = vmatmul.mubr.msk.bf16.vlgmr.msra.gmra.mxu1 %vm698_vm2, %v2349_v28 }
 0x157   : > { %2007 = vmatprep.mubr.msk.bf16.mxu0 %vm2199_vm1, %v2198_v9  ;;  %2013 = vmatprep.mubr.msk.bf16.mxu1 %vm2199_vm1, %v2198_v9 }
 0x206   : > { %v485_v29 = vpop.f32.mrf.mxu0  ;;  %v545_v30 = vpop.f32.mrf.mxu1 }
 0x207   : > { %v491_v31 = vpack.c.bf16 %v485_v29, %v485_v29  ;;  %v551_v32 = vpack.c.bf16 %v545_v30, %v545_v30 }
 0x208   : > { %v1967_v33 = vpop.f32.mrf.mxu0  ;;  %v1975_v34 = vpop.f32.mrf.mxu1 }
 0x209   : > { %493 = vst.msk [vmem:[#allocation2] sm:$0xf] %vm492_vm4, %v491_v31  ;;  %553 = vst.msk [vmem:[#allocation2 + $0x4] sm:$0xf] %vm492_vm4, %v551_v32  ;;  %v2142_v33 = vld [vmem:[%s2578_s5 + $0x18] sm:$0xff]  }
 0x20a   : > { %v488_v35 = vpop.f32.mrf.mxu0  ;;  %v548_v36 = vpop.f32.mrf.mxu1 }
 0x20c   : > { %v1968_v37 = vpop.f32.mrf.mxu0  ;;  %v1976_v38 = vpop.f32.mrf.mxu1 }
 0x20e   : > { %v605_v39 = vpop.f32.mrf.mxu0  ;;  %v665_v40 = vpop.f32.mrf.mxu1 }
 0x20f   : > { %v611_v41 = vpack.c.bf16 %v605_v39, %v605_v39  ;;  %v671_v42 = vpack.c.bf16 %v665_v40, %v665_v40  ;;  %v2143_v39 = vld [vmem:[%s2579_s6 + $0x8] sm:$0xff]  }
 0x210   : > { %v1983_v43 = vpop.f32.mrf.mxu0  ;;  %v1991_v44 = vpop.f32.mrf.mxu1  ;;  %v792_v56 = vld [vmem:[#allocation2] sm:$0xf]  ;;  %v1023_v10 = vld [vmem:[#allocation2 + $0x4] sm:$0xf] }
 0x211   : > { %613 = vst.msk [vmem:[#allocation2 + $0x8] sm:$0xf] %vm492_vm4, %v611_v41  ;;  %673 = vst.msk [vmem:[#allocation2 + $0xc] sm:$0xf] %vm492_vm4, %v671_v42  ;;  %v2459_v41 = vld [vmem:[#allocation3 + $0x8] sm:$0xff] }
 0x212   : > { %v608_v45 = vpop.f32.mrf.mxu0  ;;  %v668_v46 = vpop.f32.mrf.mxu1 }
 0x214   : > { %v1984_v47 = vpop.f32.mrf.mxu0  ;;  %v1992_v48 = vpop.f32.mrf.mxu1 }
 0x216   : > { %v736_v49 = vpop.f32.mrf.mxu0  ;;  %v785_v15 = vpop.f32.mrf.mxu1 }
 0x217   : > { %v742_v50 = vpack.c.bf16 %v736_v49, %v736_v49  ;;  %v791_v16 = vpack.c.bf16 %v785_v15, %v785_v15 }
 0x218   : > { %v1997_v51 = vpop.f32.mrf.mxu0  ;;  %v2003_v17 = vpop.f32.mrf.mxu1  ;;  %v1254_v34 = vld [vmem:[#allocation2 + $0x8] sm:$0xf] }
 0x219   : > { %v798_v52 = vsel %vm683_vm3, %v742_v50, 0  ;;  %v877_v18 = vsel %vm875_vm6, %v791_v16, 0 }
 0x21a   : > { %v739_v53 = vpop.f32.mrf.mxu0  ;;  %2006 = vmatpush3.bf16.xpose.msra.mxu0 %v798_v52  ;;  %2012 = vmatpush3.bf16.msra.mxu1 %v877_v18  ;;  %v788_v19 = vpop.f32.mrf.mxu1 }
 0x21b   : > { %2017 = vmatprep.subr.bf16.mxu0 %v2198_v9  ;;  %2023 = vmatprep.subr.bf16.mxu1 %v2198_v9 }
 0x21c   : > { %v1998_v54 = vpop.f32.mrf.mxu0  ;;  %v2004_v20 = vpop.f32.mrf.mxu1 }
 0x221   : > { %2008 = vmatmul.mubr.msk.bf16.vlgmr.msra.gmra.mxu0 %vm683_vm3, %v792_v56  ;;  %v1485_v56 = vld [vmem:[#allocation2 + $0xc] sm:$0xf] }
 0x222   : > { %2018 = vmatpush3.bf16.msra.mxu0 %v2139_v55  ;;  %2019 = vmatprep.mubr.msk.bf16.mxu0 %vm2199_vm1, %v2198_v9 }
 0x223   : > { %2029 = vmatprep.subr.bf16.mxu0 %v2198_v9 }
 0x229   : > { %2020 = vmatmul.mubr.msk.bf16.vlgmr.msra.gmra.mxu0 %vm698_vm2, %v2349_v28 }
 0x22a   : > { %2031 = vmatprep.mubr.msk.bf16.mxu0 %vm2199_vm1, %v2198_v9 }
 0x2e1   : > { %v2400_v59 = vpop.f32.mrf.mxu0 }
 0x2e2   : > { %v841_v60 = vsel %vm683_vm3, %v2400_v59, -inf }
 0x2e3   : > { %842 = vmax.xlane.f32.xlu1 %v841_v60  ;;  %v2009_v61 = vpop.f32.mrf.mxu0 }
 0x2e5   : > { %v837_v62 = vpop.f32.mrf.mxu0 }
 0x2e7   : > { %v2010_v63 = vpop.f32.mrf.mxu0 }
 0x2e9   : > { %v965_v1 = vpop.f32.mrf.mxu0 }
 0x2ea   : > { %v971_v2 = vpack.c.bf16 %v965_v1, %v965_v1 }
 0x2eb   : > { %v2021_v3 = vpop.f32.mrf.mxu0 }
 0x2ec   : > { %v1028_v4 = vsel %vm683_vm3, %v971_v2, 0 }
 0x2ed   : > { %v968_v5 = vpop.f32.mrf.mxu0  ;;  %2030 = vmatpush3.bf16.xpose.msra.mxu0 %v1028_v4 }
 0x2ee   : > { %2041 = vmatprep.subr.bf16.mxu0 %v2198_v9 }
 0x2ef   : > { %v2022_v7 = vpop.f32.mrf.mxu0 }
 0x2f4   : > { %2032 = vmatmul.mubr.msk.bf16.vlgmr.msra.gmra.mxu0 %vm683_vm3, %v1023_v10 }
 0x2f5   : > { %2042 = vmatpush3.bf16.msra.mxu0 %v2140_v8  ;;  %2043 = vmatprep.mubr.msk.bf16.mxu0 %vm2199_vm1, %v2198_v9  ;;  %v2144_v8 = vld [vmem:[%s2579_s6 + $0x10] sm:$0xff]  }
 0x2f6   : > { %2053 = vmatprep.subr.bf16.mxu0 %v2198_v9 }
 0x2fc   : > { %2044 = vmatmul.mubr.msk.bf16.vlgmr.msra.gmra.mxu0 %vm698_vm2, %v2349_v28 }
 0x2fd   : > { %2055 = vmatprep.mubr.msk.bf16.mxu0 %vm2199_vm1, %v2198_v9 }
 0x36c   : > { %v843_v12 = vpop.xlane.xlu1 %842 }
 0x36d   : > { %v2420_v13 = vmax.f32 %v2417_v11, %v843_v12  ;;  %v2490_v12 = vld [vmem:[#allocation3 + $0x10] sm:$0xff] }
 0x36f   : > { %v845_v14 = vsub.f32 %v2417_v11, %v2420_v13  ;;  %921 = vst.msk [vmem:[#allocation3] sm:$0xff] %vm674_vm5, %v2420_v13  ;;  %850 = vperm.xlu1 %2128, %v2420_v13  }
 0x3b4   : > { %v1064_v21 = vpop.f32.mrf.mxu0 }
 0x3b5   : > { %v1072_v22 = vsel %vm683_vm3, %v1064_v21, -inf }
 0x3b6   : > { %1073 = vmax.xlane.f32.xlu0 %v1072_v22  ;;  %v2033_v23 = vpop.f32.mrf.mxu0 }
 0x3b8   : > { %v1067_v24 = vpop.f32.mrf.mxu0 }
 0x3ba   : > { %v2034_v25 = vpop.f32.mrf.mxu0 }
 0x3bc   : > { %v1196_v26 = vpop.f32.mrf.mxu0 }
 0x3bd   : > { %v1202_v27 = vpack.c.bf16 %v1196_v26, %v1196_v26 }
 0x3be   : > { %v2045_v29 = vpop.f32.mrf.mxu0 }
 0x3bf   : > { %v1259_v30 = vsel %vm683_vm3, %v1202_v27, 0 }
 0x3c0   : > { %v1199_v31 = vpop.f32.mrf.mxu0  ;;  %2054 = vmatpush3.bf16.xpose.msra.mxu0 %v1259_v30 }
 0x3c1   : > { %2065 = vmatprep.subr.bf16.mxu0 %v2198_v9 }
 0x3c2   : > { %v2046_v32 = vpop.f32.mrf.mxu0 }
 0x3c7   : > { %2056 = vmatmul.mubr.msk.bf16.vlgmr.msra.gmra.mxu0 %vm683_vm3, %v1254_v34 }
 0x3c8   : > { %2066 = vmatpush3.bf16.msra.mxu0 %v2142_v33  ;;  %2067 = vmatprep.mubr.msk.bf16.mxu0 %vm2199_vm1, %v2198_v9 }
 0x3c9   : > { %2077 = vmatprep.subr.bf16.mxu0 %v2198_v9 }
 0x3cf   : > { %2068 = vmatmul.mubr.msk.bf16.vlgmr.msra.gmra.mxu0 %vm698_vm2, %v2349_v28 }
 0x3d0   : > { %2079 = vmatprep.mubr.msk.bf16.mxu0 %vm2199_vm1, %v2198_v9 }
 0x3ea   : > { %v851_v35 = vpop.permute.xlu1 %850 }
 0x3eb   : > { %v853_v36 = vsub.f32 %v2400_v59, %v851_v35 }
 0x3ed   : > { %v854_v37 = vmul.f32 1.442695, %v853_v36 }
 0x3ef   : > { %2150 = vpow2.f32 %v854_v37 }
 0x3fc   : > { %v2444_v38 = vpop.eup %2150 }
 0x3fd   : > { %v871_v40 = vpack.c.bf16 %v2444_v38, %v2444_v38 }
 0x3ff   : > { %2014 = vmatmul.mubr.msk.bf16.vlgmr.msra.gmra.mxu1 %vm683_vm3, %v871_v40  ;;  %v2145_v40 = vld [vmem:[%s2579_s6 + $0x18] sm:$0xff]  }
 0x400   : > { %2024 = vmatpush3.bf16.msra.mxu1 %v2143_v39  ;;  %2025 = vmatprep.mubr.msk.bf16.mxu1 %vm2199_vm1, %v2198_v9 }
 0x401   : > { %2035 = vmatprep.subr.bf16.mxu1 %v2198_v9 }
 0x407   : > { %2026 = vmatmul.mubr.msk.bf16.vlgmr.msra.gmra.mxu1 %vm698_vm2, %v2349_v28 }
 0x408   : > { %2037 = vmatprep.mubr.msk.bf16.mxu1 %vm2199_vm1, %v2198_v9 }
 0x43f   : > { %v1074_v42 = vpop.xlane.xlu0 %1073 }
 0x440   : > { %v2462_v43 = vmax.f32 %v2459_v41, %v1074_v42 }
 0x442   : > { %v1076_v44 = vsub.f32 %v2459_v41, %v2462_v43  ;;  %1152 = vst.msk [vmem:[#allocation3 + $0x8] sm:$0xff] %vm674_vm5, %v2462_v43  ;;  %1081 = vperm.xlu0 %2129, %v2462_v43  }
 0x487   : > { %v1295_v45 = vpop.f32.mrf.mxu0 }
 0x488   : > { %v1303_v46 = vsel %vm683_vm3, %v1295_v45, -inf }
 0x489   : > { %1304 = vmax.xlane.f32.xlu1 %v1303_v46  ;;  %v2057_v47 = vpop.f32.mrf.mxu0  ;;  %v1533_v46 = vld [vmem:[#allocation3 + $0x18] sm:$0xff] }
 0x48b   : > { %v1298_v48 = vpop.f32.mrf.mxu0 }
 0x48d   : > { %v2058_v49 = vpop.f32.mrf.mxu0 }
 0x48e   : > { %v1088_v49 = vld [vmem:[#allocation4 + $0x8] sm:$0xff] }
 0x48f   : > { %v1427_v50 = vpop.f32.mrf.mxu0 }
 0x490   : > { %v1433_v51 = vpack.c.bf16 %v1427_v50, %v1427_v50 }
 0x491   : > { %v2069_v52 = vpop.f32.mrf.mxu0 }
 0x492   : > { %v1490_v53 = vsel %vm683_vm3, %v1433_v51, 0 }
 0x493   : > { %v1430_v54 = vpop.f32.mrf.mxu0  ;;  %2078 = vmatpush3.bf16.xpose.msra.mxu0 %v1490_v53 }
 0x494   : > { %2089 = vmatprep.subr.bf16.mxu0 %v2198_v9 }
 0x495   : > { %v2070_v55 = vpop.f32.mrf.mxu0 }
 0x49a   : > { %2080 = vmatmul.mubr.msk.bf16.vlgmr.msra.gmra.mxu0 %vm683_vm3, %v1485_v56 }
 0x49b   : > { %2093 = vmatprep.mubr.msk.bf16.mxu0 %vm2199_vm1, %v2198_v9 }
 0x4bd   : > { %v1082_v57 = vpop.permute.xlu0 %1081 }
 0x4be   : > { %v1084_v58 = vsub.f32 %v1064_v21, %v1082_v57 }
 0x4bf   : > { %v2475_v59 = vpop.f32.mrf.mxu1 }
 0x4c0   : > { %v1085_v60 = vmul.f32 1.442695, %v1084_v58 }
 0x4c1   : > { %v2015_v61 = vpop.f32.mrf.mxu1 }
 0x4c2   : > { %2152 = vpow2.f32 %v1085_v60 }
 0x4c3   : > { %v916_v62 = vpop.f32.mrf.mxu1 }
 0x4c5   : > { %v2016_v63 = vpop.f32.mrf.mxu1 }
 0x4c7   : > { %v1015_v1 = vpop.f32.mrf.mxu1 }
 0x4c8   : > { %v1021_v2 = vpack.c.bf16 %v1015_v1, %v1015_v1 }
 0x4c9   : > { %v2027_v3 = vpop.f32.mrf.mxu1 }
 0x4ca   : > { %v1108_v4 = vsel %vm875_vm6, %v1021_v2, 0 }
 0x4cb   : > { %2036 = vmatpush3.bf16.msra.mxu1 %v1108_v4  ;;  %v1018_v5 = vpop.f32.mrf.mxu1 }
 0x4cc   : > { %2047 = vmatprep.subr.bf16.mxu1 %v2198_v9 }
 0x4cd   : > { %v2028_v6 = vpop.f32.mrf.mxu1 }
 0x4ce   : > { %v858_v6 = vsel %vm683_vm3, %v2444_v38, 0.0 }
 0x4cf   : > { %v2153_v7 = vpop.eup %2152 }
 0x4d0   : > { %v1103_v10 = vpack.c.bf16 %v2153_v7, %v2153_v7  ;;  %v1090_v22 = vsel %vm683_vm3, %v2153_v7, 0.0 }
 0x4d2   : > { %2038 = vmatmul.mubr.msk.bf16.vlgmr.msra.gmra.mxu1 %vm683_vm3, %v1103_v10 }
 0x4d3   : > { %2048 = vmatpush3.bf16.msra.mxu1 %v2144_v8  ;;  %2049 = vmatprep.mubr.msk.bf16.mxu1 %vm2199_vm1, %v2198_v9 }
 0x4d4   : > { %2059 = vmatprep.subr.bf16.mxu1 %v2198_v9 }
 0x4da   : > { %2050 = vmatmul.mubr.msk.bf16.vlgmr.msra.gmra.mxu1 %vm698_vm2, %v2349_v28 }
 0x4db   : > { %2061 = vmatprep.mubr.msk.bf16.mxu1 %vm2199_vm1, %v2198_v9 }
 0x512   : > { %v1305_v15 = vpop.xlane.xlu1 %1304 }
 0x513   : > { %v2493_v16 = vmax.f32 %v2490_v12, %v1305_v15  ;;  %v1319_v15 = vld [vmem:[#allocation4 + $0x10] sm:$0xff] }
 0x515   : > { %v1307_v17 = vsub.f32 %v2490_v12, %v2493_v16  ;;  %1383 = vst.msk [vmem:[#allocation3 + $0x10] sm:$0xff] %vm674_vm5, %v2493_v16  ;;  %1312 = vperm.xlu0 %2129, %v2493_v16   ;;  %v846_v12 = vmul.f32 1.442695, %v845_v14  ;;  %v1550_v16 = vld [vmem:[#allocation4 + $0x18] sm:$0xff]  ;;  %v1096_v14 = vld [vmem:[#allocation5 + $0x8] sm:$0xff] }
 0x517   : > { %v1308_v7 = vmul.f32 1.442695, %v1307_v17 }
 0x55a   : > { %v1526_v18 = vpop.f32.mrf.mxu0 }
 0x55b   : > { %v1534_v19 = vsel %vm683_vm3, %v1526_v18, -inf }
 0x55c   : > { %1535 = vmax.xlane.f32.xlu1 %v1534_v19  ;;  %v2081_v20 = vpop.f32.mrf.mxu0 }
 0x55e   : > { %v1529_v21 = vpop.f32.mrf.mxu0 }
 0x560   : > { %1091 = vadd.xlane.f32.xlu1 %v1090_v22  ;;  %v2082_v23 = vpop.f32.mrf.mxu0 }
 0x590   : > { %v1313_v24 = vpop.permute.xlu0 %1312 }
 0x591   : > { %v1315_v25 = vsub.f32 %v1295_v45, %v1313_v24  ;;  %v1077_v45 = vmul.f32 1.442695, %v1076_v44 }
 0x592   : > { %v2502_v26 = vpop.f32.mrf.mxu1 }
 0x593   : > { %v1316_v27 = vmul.f32 1.442695, %v1315_v25  ;;  %v856_v25 = vld [vmem:[#allocation4] sm:$0xff] }
 0x594   : > { %v2039_v29 = vpop.f32.mrf.mxu1 }
 0x595   : > { %2154 = vpow2.f32 %v1316_v27 }
 0x596   : > { %v1147_v30 = vpop.f32.mrf.mxu1  ;;  %2156 = vpow2.f32 %v1077_v45 }
 0x598   : > { %v2040_v31 = vpop.f32.mrf.mxu1 }
 0x59a   : > { %v1246_v32 = vpop.f32.mrf.mxu1 }
 0x59b   : > { %v1252_v33 = vpack.c.bf16 %v1246_v32, %v1246_v32 }
 0x59c   : > { %v2051_v34 = vpop.f32.mrf.mxu1 }
 0x59d   : > { %v1339_v35 = vsel %vm875_vm6, %v1252_v33, 0 }
 0x59e   : > { %2060 = vmatpush3.bf16.msra.mxu1 %v1339_v35  ;;  %v1249_v36 = vpop.f32.mrf.mxu1 }
 0x59f   : > { %2071 = vmatprep.subr.bf16.mxu1 %v2198_v9  ;;  %v1327_v36 = vld [vmem:[#allocation5 + $0x10] sm:$0xff] }
 0x5a0   : > { %v2052_v37 = vpop.f32.mrf.mxu1 }
 0x5a2   : > { %v2155_v39 = vpop.eup %2154 }
 0x5a3   : > { %v1334_v42 = vpack.c.bf16 %v2155_v39, %v2155_v39  ;;  %v2157_v47 = vpop.eup %2156  ;;  %v1321_v54 = vsel %vm683_vm3, %v2155_v39, 0.0 }
 0x5a4   : > { %v1089_v52 = vmul.f32 %v2157_v47, %v1088_v49 }
 0x5a5   : > { %2062 = vmatmul.mubr.msk.bf16.vlgmr.msra.gmra.mxu1 %vm683_vm3, %v1334_v42 }
 0x5a6   : > { %2072 = vmatpush3.bf16.msra.mxu1 %v2145_v40  ;;  %2073 = vmatprep.mubr.msk.bf16.mxu1 %vm2199_vm1, %v2198_v9 }
 0x5a7   : > { %2083 = vmatprep.subr.bf16.mxu1 %v2198_v9 }
 0x5ad   : > { %2074 = vmatmul.mubr.msk.bf16.vlgmr.msra.gmra.mxu1 %vm698_vm2, %v2349_v28 }
 0x5ae   : > { %2085 = vmatprep.mubr.msk.bf16.mxu1 %vm2199_vm1, %v2198_v9 }
 0x5e5   : > { %v1536_v48 = vpop.xlane.xlu1 %1535 }
 0x5e6   : > { %v1537_v50 = vmax.f32 %v1533_v46, %v1536_v48 }
 0x5e8   : > { %v1538_v51 = vsub.f32 %v1533_v46, %v1537_v50  ;;  %1614 = vst.msk [vmem:[#allocation3 + $0x18] sm:$0xff] %vm674_vm5, %v1537_v50  ;;  %1543 = vperm.xlu0 %2129, %v1537_v50  }
 0x5e9   : > { %v1092_v53 = vpop.xlane.xlu1 %1091 }
 0x5ea   : > { %v1093_v28 = vadd.f32 %v1092_v53, %v1089_v52  ;;  %v1539_v21 = vmul.f32 1.442695, %v1538_v51  ;;  %v1558_v51 = vld [vmem:[#allocation5 + $0x18] sm:$0xff] }
 0x5ec   : > { %1094 = vst.msk [vmem:[#allocation4 + $0x8] sm:$0xff] %vm674_vm5, %v1093_v28 }
 0x5f3   : > { %v1629_v8 = vld [vmem:[#allocation4 + $0x8] sm:$0xff] }
 0x607   : > { %1322 = vadd.xlane.f32.xlu0 %v1321_v54 }
 0x663   : > { %v1544_v41 = vpop.permute.xlu0 %1543 }
 0x664   : > { %v1546_v43 = vsub.f32 %v1526_v18, %v1544_v41 }
 0x665   : > { %v2523_v44 = vpop.f32.mrf.mxu1 }
 0x666   : > { %v1547_v55 = vmul.f32 1.442695, %v1546_v43 }
 0x667   : > { %v2063_v56 = vpop.f32.mrf.mxu1 }
 0x668   : > { %2158 = vpow2.f32 %v1547_v55  ;;  %v2146_v56 = vld [vmem:[%s2580_s7 + $0x8] sm:$0xff]  }
 0x669   : > { %v1378_v57 = vpop.f32.mrf.mxu1  ;;  %2160 = vpow2.f32 %v1308_v7  ;;  %2090 = vmatpush3.bf16.msra.mxu0 %v2146_v56 }
 0x66a   : > { %2162 = vpow2.f32 %v1539_v21  ;;  %v864_v57 = vld [vmem:[#allocation5] sm:$0xff]  ;;  %2091 = vmatprep.subr.bf16.mxu0 %v2198_v9 }
 0x66b   : > { %v2064_v58 = vpop.f32.mrf.mxu1  ;;  %2164 = vpow2.f32 %v846_v12 }
 0x66c   : > { %v2147_v58 = vld [vmem:[%s2580_s7] sm:$0xff]  }
 0x66d   : > { %v1477_v60 = vpop.f32.mrf.mxu1  ;;  %2092 = vmatpush3.bf16.msra.mxu0 %v2147_v58 }
 0x66e   : > { %v1483_v61 = vpack.c.bf16 %v1477_v60, %v1477_v60 }
 0x66f   : > { %v2075_v62 = vpop.f32.mrf.mxu1 }
 0x670   : > { %v1570_v63 = vsel %vm875_vm6, %v1483_v61, 0 }
 0x671   : > { %2084 = vmatpush3.bf16.msra.mxu1 %v1570_v63  ;;  %v1480_v1 = vpop.f32.mrf.mxu1 }
 0x673   : > { %v2076_v2 = vpop.f32.mrf.mxu1 }
 0x675   : > { %v2159_v3 = vpop.eup %2158 }
 0x676   : > { %v1552_v4 = vsel %vm683_vm3, %v2159_v3, 0.0  ;;  %v1565_v5 = vpack.c.bf16 %v2159_v3, %v2159_v3  ;;  %v2161_v10 = vpop.eup %2160 }
 0x677   : > { %1553 = vadd.xlane.f32.xlu1 %v1552_v4  ;;  %v1320_v18 = vmul.f32 %v2161_v10, %v1319_v15  ;;  %v2163_v38 = vpop.eup %2162  ;;  %v1911_v15 = vld [vmem:[%s2581_s8] ss:$0 sm:$0xff] }
 0x678   : > { %2086 = vmatmul.mubr.msk.bf16.vlgmr.msra.gmra.mxu1 %vm683_vm3, %v1565_v5  ;;  %v1551_v17 = vmul.f32 %v2163_v38, %v1550_v16  ;;  %v2165_v23 = vpop.eup %2164 }
 0x679   : > { %v857_v29 = vmul.f32 %v2165_v23, %v856_v25 }
 0x67b   : > { %859 = vadd.xlane.f32.xlu1 %v858_v6 }
 0x68c   : > { %1632 = vperm.xlu1 %2128, %v1629_v8  }
 0x690   : > { %v1323_v19 = vpop.xlane.xlu0 %1322 }
 0x691   : > { %v1324_v20 = vadd.f32 %v1323_v19, %v1320_v18 }
 0x693   : > { %1325 = vst.msk [vmem:[#allocation4 + $0x10] sm:$0xff] %vm674_vm5, %v1324_v20 }
 0x69a   : > { %v1644_v22 = vld [vmem:[#allocation4 + $0x10] sm:$0xff] }
 0x69b   : > { %1647 = vperm.xlu1 %2128, %v1644_v22  }
 0x69f   : > { %1099 = vperm.xlu1 %2128, %v2157_v47  }
 0x6a3   : > { %1330 = vperm.xlu1 %2128, %v2161_v10  }
 0x6a7   : > { %1561 = vperm.xlu1 %2128, %v2163_v38  }
 0x700   : > { %v1554_v24 = vpop.xlane.xlu1 %1553 }
 0x701   : > { %v1555_v27 = vadd.f32 %v1554_v24, %v1551_v17 }
 0x703   : > { %1556 = vst.msk [vmem:[#allocation4 + $0x18] sm:$0xff] %vm674_vm5, %v1555_v27 }
 0x704   : > { %v860_v30 = vpop.xlane.xlu1 %859 }
 0x705   : > { %v861_v31 = vadd.f32 %v860_v30, %v857_v29 }
 0x707   : > { %863 = vst.msk [vmem:[#allocation4] sm:$0xff] %vm674_vm5, %v861_v31 }
 0x708   : > { %v1633_v11 = vpop.permute.xlu1 %1632 }
 0x709   : > { %2166 = vrcp.f32 %v1633_v11 }
 0x70a   : > { %v1659_v32 = vld [vmem:[#allocation4 + $0x18] sm:$0xff] }
 0x70b   : > { %1662 = vperm.xlu0 %2129, %v1659_v32  }
 0x70e   : > { %v1619_v33 = vld [vmem:[#allocation4] sm:$0xff] }
 0x70f   : > { %1622 = vperm.xlu1 %2128, %v1619_v33  }
 0x713   : > { %867 = vperm.xlu1 %2128, %v2165_v23  }
 0x716   : > { %v1648_v13 = vpop.permute.xlu1 %1647  ;;  %v2167_v45 = vpop.eup %2166 }
 0x717   : > { %2168 = vrcp.f32 %v1648_v13 }
 0x71a   : > { %v1100_v34 = vpop.permute.xlu1 %1099 }
 0x71b   : > { %v1102_v35 = vmul.f32 %v1100_v34, %v1096_v14 }
 0x71d   : > { %v1150_v37 = vadd.f32 %v2502_v26, %v1102_v35 }
 0x71e   : > { %v1331_v39 = vpop.permute.xlu1 %1330 }
 0x71f   : > { %1151 = vst.msk [vmem:[#allocation5 + $0x8] sm:$0xff] %vm683_vm3, %v1150_v37  ;;  %v1333_v40 = vmul.f32 %v1331_v39, %v1327_v36 }
 0x721   : > { %v1381_v42 = vadd.f32 %v2523_v44, %v1333_v40 }
 0x722   : > { %v1562_v26 = vpop.permute.xlu1 %1561 }
 0x723   : > { %1382 = vst.msk [vmem:[#allocation5 + $0x10] sm:$0xff] %vm683_vm3, %v1381_v42  ;;  %v1564_v52 = vmul.f32 %v1562_v26, %v1558_v51 }
 0x724   : > { %v2169_v48 = vpop.eup %2168 }
 0x726   : > { %v1628_v46 = vld [vmem:[#allocation5 + $0x8] sm:$0xff] }
 0x727   : > { %v1636_v47 = vmul.f32 %v2167_v45, %v1628_v46 }
 0x729   : > { %1638 = vrot.lane.b32.xlu1 %v1636_v47, %s2202_s22 }
 0x72a   : > { %v1643_v49 = vld [vmem:[#allocation5 + $0x10] sm:$0xff] }
 0x72b   : > { %v1651_v50 = vmul.f32 %v2169_v48, %v1643_v49 }
 0x72d   : > { %1653 = vrot.lane.b32.xlu0 %v1651_v50, %s2203_s23 }
 0x738   : > { %v1606_v53 = vpop.f32.mrf.mxu1 }
 0x739   : > { %v1612_v28 = vadd.f32 %v1606_v53, %v1564_v52 }
 0x73a   : > { %v2087_v54 = vpop.f32.mrf.mxu1 }
 0x73b   : > { %1613 = vst.msk [vmem:[#allocation5 + $0x18] sm:$0xff] %vm683_vm3, %v1612_v28 }
 0x73c   : > { %v1609_v41 = vpop.f32.mrf.mxu1 }
 0x73e   : > { %v2088_v43 = vpop.f32.mrf.mxu1 }
 0x742   : > { %v1658_v1 = vld [vmem:[#allocation5 + $0x18] sm:$0xff] }
 0x786   : > { %v1663_v44 = vpop.permute.xlu0 %1662 }
 0x787   : > { %2170 = vrcp.f32 %v1663_v44 }
 0x78a   : > { %v1623_v55 = vpop.permute.xlu1 %1622 }
 0x78b   : > { %2172 = vrcp.f32 %v1623_v55 }
 0x78e   : > { %v868_v60 = vpop.permute.xlu1 %867 }
 0x78f   : > { %v870_v61 = vmul.f32 %v868_v60, %v864_v57 }
 0x791   : > { %v919_v62 = vadd.f32 %v2475_v59, %v870_v61 }
 0x793   : > { %920 = vst.msk [vmem:[#allocation5] sm:$0xff] %vm683_vm3, %v919_v62 }
 0x794   : > { %v2171_v63 = vpop.eup %2170 }
 0x795   : > { %v1666_v2 = vmul.f32 %v2171_v63, %v1658_v1 }
 0x797   : > { %1668 = vrot.lane.b32.xlu1 %v1666_v2, %s2204_s28 }
 0x798   : > { %v2173_v3 = vpop.eup %2172 }
 0x79a   : > { %v1618_v4 = vld [vmem:[#allocation5] sm:$0xff] }
 0x79b   : > { %v1626_v5 = vmul.f32 %v2173_v3, %v1618_v4  ;;  %v1639_v9 = vpop.permute.xlu1 %1638 }
 0x79d   : > { %1627 = vst.msk [vmem:[#allocation6] sm:$0xff] %vm683_vm3, %v1626_v5 }
 0x79e   : > { %1642 = vst.msk [vmem:[#allocation6] sm:$0xff] %vm1641_vm7, %v1639_v9 }
 0x79f   : > { %v1654_v6 = vpop.permute.xlu0 %1653 }
 0x7a0   : > { %1657 = vst.msk [vmem:[#allocation6] sm:$0xff] %vm1656_vm8, %v1654_v6 }
 0x809   : > { %v1669_v59 = vpop.permute.xlu1 %1668 }
 0x80a   : > { %1672 = vst.msk [vmem:[#allocation6] sm:$0xff] %vm1671_vm9, %v1669_v59 }
 0x811   : > { %v1673_v7 = vld [vmem:[#allocation6] sm:$0xff] }
 0x812   : > { %v1674_v8 = vpack.c.bf16 %v1673_v7, %v1673_v7 }
 0x814   : > { %2094 = vmatmul.mubr.msk.bf16.vlgmr.msra.gmra.mxu0 %vm402_vm0, %v1674_v8 }
 0x8d4   : > { %v1729_v10 = vpop.f32.mrf.mxu0 }
 0x8d5   : > { %v1736_v18 = vadd.f32 %v1729_v10, %v2279_v0 }
 0x8d6   : > { %v2095_v19 = vpop.f32.mrf.mxu0 }
 0x8d7   : > { %v1744_v20 = vadd.f32 %v1911_v15, %v1736_v18 }
 0x8d8   : > { %v1732_v21 = vpop.f32.mrf.mxu0 }
 0x8d9   : > { %1745 = vst.msk [vmem:[%s393_s16] sm:$0xff] %vm402_vm0, %v1744_v20 }
 0x8da   : > { %v2096_v22 = vpop.f32.mrf.mxu0 }
 0x8db PF: > { %s19_s11 = sadd.s32 1, %s2196_s11   ;;  %s2583_s30 = smov %s2192_s10 }
 0x8dc   : > { %p16_p5 = scmp.ge.s32.totalorder %s19_s11, 4   ;;  %s2584_s10 = smov %s2586_s12 }
 0x8de   :  { %18 = sbr.rel (!%p16_p5) target bundleno = 2 (0x2), region = 121 }

</bundles_post_ra>
